<compile_context>
chip_gen: v7x
topology: tpu7x:2x2x1
jax: 0.10.0
libtpu: 0.0.40
codegen_flags: <defaults>
</compile_context>

<pallas_src>
import jax
import jax.numpy as jnp
from jax.experimental import pallas as pl
from jax.experimental.pallas import tpu as pltpu

_VMEM_LIMIT_BYTES = 48 * 1024 * 1024   # fits v7x's 64 MiB/TC; ample on v5e/v6e.


def _round_up(x, m):
    return ((x + m - 1) // m) * m


def _largest_divisor_tile(n, preferred, align):
    """Largest multiple of `align` that divides `n`, capped at `preferred`.
    `n` must itself be a multiple of `align` (so `align` always works)."""
    t = min(preferred, n)
    t -= t % align
    while t > align:
        if n % t == 0:
            return t
        t -= align
    return align


def _tiling(n, tile_m, tile_k):
    """Pad N and pick (tm, tk) so both divide padded N, stay (8,128) aligned,
    and the 'parallel' row axis gets >= 2 tiles when possible (keeps both v7x
    TensorCores busy).  Padding keeps the pipelined fast path for ragged N."""
    align = 512 if n > 1024 else 128
    n_pad = _round_up(n, align)
    tk = _largest_divisor_tile(n_pad, tile_k, align)
    tm_cap = tile_m if n_pad > tile_m else max(n_pad // 2, 8)
    tm = _largest_divisor_tile(n_pad, min(tm_cap, n_pad), 8)
    return n_pad, tm, tk


# ----------------------------------------------------------------------------
# Fused dual-GCN layer:  PReLU( [D_dst^-1/2] (A o EW) [D_src^-1/2] [X|Xs] [W] + b )
# ----------------------------------------------------------------------------
def _make_gcn_kernel(normalize: bool, apply_weight: bool, f_in: int):
    def kernel(*refs):
        idx = 0
        aw_ref = refs[idx]; idx += 1
        ddst_ref = None
        if normalize:
            ddst_ref = refs[idx]; idx += 1
        x_ref = refs[idx]; idx += 1
        w_ref = None
        if apply_weight:
            w_ref = refs[idx]; idx += 1
        b_ref, alpha_ref, out_ref, acc_ref = refs[idx:idx + 4]

        k = pl.program_id(1)

        @pl.when(k == 0)
        def _():
            acc_ref[...] = jnp.zeros_like(acc_ref)

        # Single bf16 (A o EW) stream; f32 accumulation on the MXU.
        acc_ref[...] += jnp.dot(aw_ref[...], x_ref[...],
                                preferred_element_type=jnp.float32)

        @pl.when(k == pl.num_programs(1) - 1)
        def _():
            agg = acc_ref[...]
            if normalize:
                agg = agg * ddst_ref[...]            # destination-side degree norm
            if apply_weight:
                # Two half-width bf16 dots (skips the zero blocks of the
                # block-diagonal weight the previous version shipped).
                a = agg.astype(jnp.bfloat16)
                w = w_ref[...]
                z = jnp.concatenate(
                    [jnp.dot(a[:, :f_in], w, preferred_element_type=jnp.float32),
                     jnp.dot(a[:, f_in:], w, preferred_element_type=jnp.float32)],
                    axis=1)
            else:
                z = agg
            z = z + b_ref[...]
            # PReLU with a single shared slope (nn.PReLU() default).
            out_ref[...] = jnp.where(z > 0.0, z, alpha_ref[...] * z).astype(out_ref.dtype)
            # TODO(synk): fuse the AvgPooling column sums (row-masked partial
            # sums per row tile) into this epilogue to drop the extra N*D read
            # the readout's pooling currently does in XLA.

    return kernel


def gcn_fused(adj, ew, feat, shuf_feat, w, b, alpha, *, normalize,
              tile_m=1024, tile_k=2048):
    """One GraphConv layer applied to feat and shuf_feat in a single pass.

    Returns (n_pad, 2*out_dim) bf16 = [ GCN(adj, feat) | GCN(adj, shuf_feat) ].
    Rows >= N are padding junk that callers slice away.
    """
    n = adj.shape[0]
    f_in, d_out = w.shape
    n_pad, tm, tk = _tiling(n, tile_m, tile_k)

    # --- single fused XLA pre-pass over the N^2 data -------------------------
    # One multiply+cast pass produces ONE bf16 stream for the kernel; the
    # unweighted-degree reductions (norm='both') fuse into the same read.
    adj_f32 = adj.astype(jnp.float32)
    aw = (adj_f32 * ew.astype(jnp.float32)).astype(jnp.bfloat16)

    apply_weight = f_in <= d_out
    if apply_weight:
        x = jnp.concatenate([feat, shuf_feat], axis=1).astype(jnp.float32)   # (n, 2*f_in)
    else:
        # f_in > d_out: project first (cheap XLA matmul), aggregate the
        # narrower embedding, skip the in-kernel weight matmul entirely.
        wf = jnp.asarray(w, jnp.float32)
        x = jnp.concatenate([feat @ wf, shuf_feat @ wf], axis=1)             # (n, 2*d_out)

    if normalize:
        # DGL GraphConv(norm='both'): unweighted degrees clamped to >= 1.
        nz = (adj_f32 != 0).astype(jnp.float32)
        d_dst = jnp.maximum(jnp.sum(nz, axis=1), 1.0) ** -0.5                # in-degree(dst)
        d_src = jnp.maximum(jnp.sum(nz, axis=0), 1.0) ** -0.5                # out-degree(src)
        x = x * d_src[:, None]          # source-side norm hoisted out of the kernel
    x = x.astype(jnp.bfloat16)
    c_in = x.shape[1]

    pad = n_pad - n
    if pad:
        aw = jnp.pad(aw, ((0, pad), (0, pad)))
        x = jnp.pad(x, ((0, pad), (0, 0)))

    in_specs = [pl.BlockSpec((tm, tk), lambda i, k: (i, k))]                 # (A o EW) bf16
    args = [aw]
    if normalize:
        dd = d_dst.reshape(n, 1)
        if pad:
            dd = jnp.pad(dd, ((0, pad), (0, 0)), constant_values=1.0)
        in_specs.append(pl.BlockSpec((tm, 1), lambda i, k: (i, 0)))          # d_dst^-1/2
        args.append(dd)
    in_specs.append(pl.BlockSpec((tk, c_in), lambda i, k: (k, 0)))           # [feat | shuf]
    args.append(x)
    if apply_weight:
        in_specs.append(pl.BlockSpec((f_in, d_out), lambda i, k: (0, 0)))    # W (bf16)
        args.append(jnp.asarray(w, jnp.bfloat16))
    in_specs += [
        pl.BlockSpec((1, 2 * d_out), lambda i, k: (0, 0)),                   # bias (x2)
        pl.BlockSpec((1, 1), lambda i, k: (0, 0)),                           # PReLU slope
    ]
    args += [
        jnp.tile(jnp.asarray(b, jnp.float32).reshape(1, d_out), (1, 2)),
        jnp.asarray(alpha, jnp.float32).reshape(1, 1),
    ]

    return pl.pallas_call(
        _make_gcn_kernel(normalize, apply_weight, f_in),
        out_shape=jax.ShapeDtypeStruct((n_pad, 2 * d_out), jnp.bfloat16),
        grid=(n_pad // tm, n_pad // tk),
        in_specs=in_specs,
        out_specs=pl.BlockSpec((tm, 2 * d_out), lambda i, k: (i, 0)),
        scratch_shapes=[pltpu.VMEM((tm, c_in), jnp.float32)],
        compiler_params=pltpu.CompilerParams(
            dimension_semantics=("parallel", "arbitrary"),
            vmem_limit_bytes=_VMEM_LIMIT_BYTES,
        ),
    )(*args)


# ----------------------------------------------------------------------------
# Discriminator: node-block tiled bilinear scoring (no concat, no transpose).
# Readout c = sigmoid(mean(h)) and v = c @ W^T are tiny and left to XLA.
# ----------------------------------------------------------------------------
def _disc_kernel(ha_ref, hb_ref, ua_ref, ub_ref, bb_ref, out_ref):
    s = jnp.dot(ha_ref[...], ua_ref[...], preferred_element_type=jnp.float32)
    s = s + jnp.dot(hb_ref[...], ub_ref[...], preferred_element_type=jnp.float32)
    out_ref[...] = s + bb_ref[...]


def discriminator(ha, hb, n, w_bil, b_bil):
    n_pad, two_d = ha.shape
    d = two_d // 2
    td = _largest_divisor_tile(n_pad, 1024, 8)

    # AvgPooling over the real N nodes + sigmoid readout (tiny N*D reduction).
    c1 = jax.nn.sigmoid(jnp.mean(ha[:n, :d].astype(jnp.float32), axis=0))    # from h1
    c2 = jax.nn.sigmoid(jnp.mean(hb[:n, :d].astype(jnp.float32), axis=0))    # from h2

    # Bilinear(h, c) = h . (W @ c) + b, so precompute v = c @ W^T once and pack
    # the four alignments into two (2D, 4) score matrices:
    #   aln_1 = h2.v1, aln_2 = h1.v2, aln_3 = h4.v1, aln_4 = h3.v2.
    wb = jnp.asarray(w_bil, jnp.float32)
    v1 = c1 @ wb.T
    v2 = c2 @ wb.T
    z = jnp.zeros((d,), jnp.float32)
    u_a = jnp.stack([jnp.concatenate([z, z]), jnp.concatenate([v2, z]),
                     jnp.concatenate([z, z]), jnp.concatenate([z, v2])], axis=1)
    u_b = jnp.stack([jnp.concatenate([v1, z]), jnp.concatenate([z, z]),
                     jnp.concatenate([z, v1]), jnp.concatenate([z, z])], axis=1)

    scores = pl.pallas_call(
        _disc_kernel,
        out_shape=jax.ShapeDtypeStruct((n_pad, 4), jnp.float32),
        grid=(n_pad // td,),
        in_specs=[
            pl.BlockSpec((td, two_d), lambda i: (i, 0)),   # [h1 | h3] tile
            pl.BlockSpec((td, two_d), lambda i: (i, 0)),   # [h2 | h4] tile
            pl.BlockSpec((two_d, 4), lambda i: (0, 0)),    # U_a
            pl.BlockSpec((two_d, 4), lambda i: (0, 0)),    # U_b
            pl.BlockSpec((1, 1), lambda i: (0, 0)),        # bilinear bias
        ],
        out_specs=pl.BlockSpec((td, 4), lambda i: (i, 0)),
        compiler_params=pltpu.CompilerParams(
            dimension_semantics=("parallel",),
            vmem_limit_bytes=_VMEM_LIMIT_BYTES,
        ),
    )(ha, hb, u_a.astype(jnp.bfloat16), u_b.astype(jnp.bfloat16),
      jnp.asarray(b_bil, jnp.float32).reshape(1, 1))

    # (n, 4) -> row-major (4, n) == torch.cat((aln_1, aln_2, aln_3, aln_4)).
    return scores[:n].T.reshape(-1)


# ----------------------------------------------------------------------------
# SSL forward (encoder='gcn' path of the PyTorch module).
# ----------------------------------------------------------------------------
def ssl_forward(params, adj1, adj2, feat, shuf_feat, ew1, ew2):
    n = adj1.shape[0]
    # encoder1: GraphConv(norm='both') + PReLU; encoder2: norm='none' + PReLU.
    # Each adjacency is streamed once (bf16) and used for both feat and shuf_feat.
    h13 = gcn_fused(adj1, ew1, feat, shuf_feat, params["w1"], params["b1"],
                    params["alpha1"], normalize=True)      # [h1 | h3]
    h24 = gcn_fused(adj2, ew2, feat, shuf_feat, params["w2"], params["b2"],
                    params["alpha2"], normalize=False)     # [h2 | h4]
    return discriminator(h13, h24, n, params["w_bil"], params["b_bil"])


# Pure-JAX reference (same semantics, f32) for a self-check.
def ssl_reference(params, adj1, adj2, feat, shuf_feat, ew1, ew2):
    def prelu(x, a):
        return jnp.where(x > 0, x, a * x)

    def gcn(adj, ew, x, w, b, a, normalize):
        A = adj * ew
        if normalize:
            nz = (adj != 0).astype(jnp.float32)
            d_dst = jnp.maximum(nz.sum(axis=1), 1.0) ** -0.5
            d_src = jnp.maximum(nz.sum(axis=0), 1.0) ** -0.5
            A = d_dst[:, None] * A * d_src[None, :]
        return prelu(A @ x @ w + b, a)

    h1 = gcn(adj1, ew1, feat, params["w1"], params["b1"], params["alpha1"], True)
    h3 = gcn(adj1, ew1, shuf_feat, params["w1"], params["b1"], params["alpha1"], True)
    h2 = gcn(adj2, ew2, feat, params["w2"], params["b2"], params["alpha2"], False)
    h4 = gcn(adj2, ew2, shuf_feat, params["w2"], params["b2"], params["alpha2"], False)
    c1 = jax.nn.sigmoid(jnp.mean(h1, axis=0))
    c2 = jax.nn.sigmoid(jnp.mean(h2, axis=0))
    wb, bb = params["w_bil"], params["b_bil"]

    def bil(h, c):
        return h @ wb @ c + bb

    return jnp.concatenate([bil(h2, c1), bil(h1, c2), bil(h4, c1), bil(h3, c2)])


def init_params(key, in_dim, out_dim):
    ks = jax.random.split(key, 3)
    scale_in = 1.0 / jnp.sqrt(in_dim)
    scale_out = 1.0 / jnp.sqrt(out_dim)
    return {
        "w1": jax.random.normal(ks[0], (in_dim, out_dim), jnp.float32) * scale_in,
        "b1": jnp.zeros((out_dim,), jnp.float32),
        "alpha1": jnp.asarray(0.25, jnp.float32),           # nn.PReLU() default
        "w2": jax.random.normal(ks[1], (in_dim, out_dim), jnp.float32) * scale_in,
        "b2": jnp.zeros((out_dim,), jnp.float32),
        "alpha2": jnp.asarray(0.25, jnp.float32),
        # nn.Bilinear(out_dim, out_dim, 1): weight (1, D, D) -> the (D, D) slab
        "w_bil": jax.random.normal(ks[2], (out_dim, out_dim), jnp.float32) * scale_out,
        "b_bil": jnp.asarray(0.1, jnp.float32),
    }


if __name__ == "__main__":
    N, in_dim, out_dim = 16, 8, 32
    key = jax.random.PRNGKey(0)
    kp, ka1, ka2, kf, ks, kw1, kw2 = jax.random.split(key, 7)

    params = init_params(kp, in_dim, out_dim)

    # Dense synthetic graphs (0/1 adjacency masks with self loops) + edge weights.
    eye = jnp.eye(N, dtype=jnp.float32)
    adj1 = jnp.maximum((jax.random.uniform(ka1, (N, N)) < 0.3).astype(jnp.float32), eye)
    adj2 = jnp.maximum((jax.random.uniform(ka2, (N, N)) < 0.3).astype(jnp.float32), eye)
    ew1 = jax.random.uniform(kw1, (N, N), jnp.float32, 0.5, 1.5)
    ew2 = jax.random.uniform(kw2, (N, N), jnp.float32, 0.5, 1.5)

    feat = jax.random.normal(kf, (N, in_dim), jnp.float32)
    shuf_feat = feat[jax.random.permutation(ks, N)]          # DGI-style corruption

    logits = jax.jit(ssl_forward)(params, adj1, adj2, feat, shuf_feat, ew1, ew2)
    jax.block_until_ready(logits)

    assert logits.shape == (4 * N,), logits.shape
    assert bool(jnp.all(jnp.isfinite(logits)))

    # Loose check vs the f32 reference (kernel runs bf16 MXU blocks).
    ref = ssl_reference(params, adj1, adj2, feat, shuf_feat, ew1, ew2)
    rel_err = float(jnp.max(jnp.abs(logits - ref)) / (jnp.max(jnp.abs(ref)) + 1e-6))
    assert rel_err < 0.08, rel_err

    print("KERNEL_OK")
</pallas_src>

<mosaic_0001>
module attributes {stable_mosaic.version = 11 : i64} {
  func.func @kernel(%arg0: i32, %arg1: i32, %arg2: memref<64x128xbf16, #tpu.memory_space<vmem>>, %arg3: memref<64x1xf32, #tpu.memory_space<vmem>>, %arg4: memref<128x16xbf16, #tpu.memory_space<vmem>>, %arg5: memref<8x32xbf16, #tpu.memory_space<vmem>>, %arg6: memref<1x64xf32, #tpu.memory_space<vmem>>, %arg7: memref<1x1xf32, #tpu.memory_space<vmem>>, %arg8: memref<64x64xbf16, #tpu.memory_space<vmem>>, %arg9: memref<64x16xf32, #tpu.memory_space<vmem>>) attributes {dimension_semantics = [#tpu.dimension_semantics<parallel>, #tpu.dimension_semantics<arbitrary>], iteration_bounds = array<i64: 2, 1>, scalar_prefetch = 0 : i64, scratch_operands = 1 : i64, tpu.core_type = #tpu.core_type<tc>, window_params = [{transform_indices = @transform_0, window_bounds = array<i64: 64, 128>}, {transform_indices = @transform_1, window_bounds = array<i64: 64, 1>}, {transform_indices = @transform_2, window_bounds = array<i64: 128, 16>}, {pipeline_mode = #tpu.pipeline_mode<synchronous>, transform_indices = @transform_3, window_bounds = array<i64: 8, 32>}, {pipeline_mode = #tpu.pipeline_mode<synchronous>, transform_indices = @transform_4, window_bounds = array<i64: 1, 64>}, {pipeline_mode = #tpu.pipeline_mode<synchronous>, transform_indices = @transform_5, window_bounds = array<i64: 1, 1>}, {transform_indices = @transform_6, window_bounds = array<i64: 64, 64>}]} {
    %c0_i32 = arith.constant 0 : i32
    %0 = arith.cmpi eq, %arg1, %c0_i32 : i32
    %1 = arith.extui %0 : i1 to i32
    %c0_i32_0 = arith.constant 0 : i32
    %2 = arith.cmpi ne, %1, %c0_i32_0 : i32
    scf.if %2 {
      %cst_10 = arith.constant 0.000000e+00 : f32
      %12 = vector.broadcast %cst_10 : f32 to vector<64x16xf32>
      %c0_11 = arith.constant 0 : index
      %c0_12 = arith.constant 0 : index
      %13 = vector.load %arg9[%c0_11, %c0_12] : memref<64x16xf32, #tpu.memory_space<vmem>>, vector<64x16xf32>
      tpu.vector_store %arg9[%c0_11, %c0_12], %12 {strides = array<i32>} : memref<64x16xf32, #tpu.memory_space<vmem>>, vector<64x16xf32>,
    } else {
    }
    %c0 = arith.constant 0 : index
    %c0_1 = arith.constant 0 : index
    %3 = vector.load %arg9[%c0, %c0_1] : memref<64x16xf32, #tpu.memory_space<vmem>>, vector<64x16xf32>
    %c0_2 = arith.constant 0 : index
    %c0_3 = arith.constant 0 : index
    %4 = vector.load %arg2[%c0_2, %c0_3] : memref<64x128xbf16, #tpu.memory_space<vmem>>, vector<64x128xbf16>
    %c0_4 = arith.constant 0 : index
    %c0_5 = arith.constant 0 : index
    %5 = vector.load %arg4[%c0_4, %c0_5] : memref<128x16xbf16, #tpu.memory_space<vmem>>, vector<128x16xbf16>
    %cst = arith.constant dense<0.000000e+00> : vector<64x16xf32>
    %6 = tpu.matmul %4, %5, %cst {dimension_numbers = #tpu.dot_dimension_numbers<[1], [0], [0], [1], [0, 0, 1, 1], [], []>} : vector<64x128xbf16>, vector<128x16xbf16>, vector<64x16xf32> -> vector<64x16xf32>
    %7 = arith.addf %3, %6 : vector<64x16xf32>
    %c0_6 = arith.constant 0 : index
    %c0_7 = arith.constant 0 : index
    %8 = vector.load %arg9[%c0_6, %c0_7] : memref<64x16xf32, #tpu.memory_space<vmem>>, vector<64x16xf32>
    tpu.vector_store %arg9[%c0_6, %c0_7], %7 {strides = array<i32>} : memref<64x16xf32, #tpu.memory_space<vmem>>, vector<64x16xf32>,
    %c0_i32_8 = arith.constant 0 : i32
    %9 = arith.cmpi eq, %arg1, %c0_i32_8 : i32
    %10 = arith.extui %9 : i1 to i32
    %c0_i32_9 = arith.constant 0 : i32
    %11 = arith.cmpi ne, %10, %c0_i32_9 : i32
    scf.if %11 {
      %c0_10 = arith.constant 0 : index
      %c0_11 = arith.constant 0 : index
      %12 = vector.load %arg9[%c0_10, %c0_11] : memref<64x16xf32, #tpu.memory_space<vmem>>, vector<64x16xf32>
      %c0_12 = arith.constant 0 : index
      %c0_13 = arith.constant 0 : index
      %13 = vector.load %arg3[%c0_12, %c0_13] : memref<64x1xf32, #tpu.memory_space<vmem>>, vector<64x1xf32>
      %14 = vector.broadcast %13 : vector<64x1xf32> to vector<64x16xf32>
      %15 = arith.mulf %12, %14 : vector<64x16xf32>
      %16 = arith.truncf %15 : vector<64x16xf32> to vector<64x16xbf16>
      %c0_14 = arith.constant 0 : index
      %c0_15 = arith.constant 0 : index
      %17 = vector.load %arg5[%c0_14, %c0_15] : memref<8x32xbf16, #tpu.memory_space<vmem>>, vector<8x32xbf16>
      %18 = vector.extract_strided_slice %16 {offsets = [0, 0], sizes = [64, 8], strides = [1, 1]} : vector<64x16xbf16> to vector<64x8xbf16>
      %cst_16 = arith.constant dense<0.000000e+00> : vector<64x32xf32>
      %19 = tpu.matmul %18, %17, %cst_16 {dimension_numbers = #tpu.dot_dimension_numbers<[1], [0], [0], [1], [0, 0, 1, 1], [], []>} : vector<64x8xbf16>, vector<8x32xbf16>, vector<64x32xf32> -> vector<64x32xf32>
      %20 = vector.extract_strided_slice %16 {offsets = [0, 8], sizes = [64, 8], strides = [1, 1]} : vector<64x16xbf16> to vector<64x8xbf16>
      %cst_17 = arith.constant dense<0.000000e+00> : vector<64x32xf32>
      %21 = tpu.matmul %20, %17, %cst_17 {dimension_numbers = #tpu.dot_dimension_numbers<[1], [0], [0], [1], [0, 0, 1, 1], [], []>} : vector<64x8xbf16>, vector<8x32xbf16>, vector<64x32xf32> -> vector<64x32xf32>
      %22 = tpu.concatenate %19, %21 in 1 : vector<64x32xf32>, vector<64x32xf32> -> vector<64x64xf32>
      %c0_18 = arith.constant 0 : index
      %c0_19 = arith.constant 0 : index
      %23 = vector.load %arg6[%c0_18, %c0_19] : memref<1x64xf32, #tpu.memory_space<vmem>>, vector<1x64xf32>
      %24 = vector.broadcast %23 : vector<1x64xf32> to vector<64x64xf32>
      %25 = arith.addf %22, %24 : vector<64x64xf32>
      %cst_20 = arith.constant 0.000000e+00 : f32
      %26 = vector.broadcast %cst_20 : f32 to vector<64x64xf32>
      %27 = arith.cmpf ogt, %25, %26 : vector<64x64xf32>
      %c0_21 = arith.constant 0 : index
      %c0_22 = arith.constant 0 : index
      %28 = vector.load %arg7[%c0_21, %c0_22] : memref<1x1xf32, #tpu.memory_space<vmem>>, vector<1x1xf32>
      %29 = vector.broadcast %28 : vector<1x1xf32> to vector<64x64xf32>
      %30 = arith.mulf %29, %25 : vector<64x64xf32>
      %31 = arith.select %27, %25, %30 : vector<64x64xi1>, vector<64x64xf32>
      %32 = arith.truncf %31 : vector<64x64xf32> to vector<64x64xbf16>
      %c0_23 = arith.constant 0 : index
      %c0_24 = arith.constant 0 : index
      %33 = vector.load %arg8[%c0_23, %c0_24] : memref<64x64xbf16, #tpu.memory_space<vmem>>, vector<64x64xbf16>
      tpu.vector_store %arg8[%c0_23, %c0_24], %32 {strides = array<i32>} : memref<64x64xbf16, #tpu.memory_space<vmem>>, vector<64x64xbf16>,
    } else {
    }
    return
  }
  func.func @transform_0(%arg0: i32, %arg1: i32) -> (i32, i32) {
    %c0_i32 = arith.constant 0 : i32
    return %arg0, %arg1 : i32, i32
  }
  func.func @transform_1(%arg0: i32, %arg1: i32) -> (i32, i32) {
    %c0_i32 = arith.constant 0 : i32
    %c0_i32_0 = arith.constant 0 : i32
    return %arg0, %c0_i32 : i32, i32
  }
  func.func @transform_2(%arg0: i32, %arg1: i32) -> (i32, i32) {
    %c0_i32 = arith.constant 0 : i32
    %c0_i32_0 = arith.constant 0 : i32
    return %arg1, %c0_i32 : i32, i32
  }
  func.func @transform_3(%arg0: i32, %arg1: i32) -> (i32, i32) {
    %c0_i32 = arith.constant 0 : i32
    %c0_i32_0 = arith.constant 0 : i32
    %c0_i32_1 = arith.constant 0 : i32
    return %c0_i32, %c0_i32_0 : i32, i32
  }
  func.func @transform_4(%arg0: i32, %arg1: i32) -> (i32, i32) {
    %c0_i32 = arith.constant 0 : i32
    %c0_i32_0 = arith.constant 0 : i32
    %c0_i32_1 = arith.constant 0 : i32
    return %c0_i32, %c0_i32_0 : i32, i32
  }
  func.func @transform_5(%arg0: i32, %arg1: i32) -> (i32, i32) {
    %c0_i32 = arith.constant 0 : i32
    %c0_i32_0 = arith.constant 0 : i32
    %c0_i32_1 = arith.constant 0 : i32
    return %c0_i32, %c0_i32_0 : i32, i32
  }
  func.func @transform_6(%arg0: i32, %arg1: i32) -> (i32, i32) {
    %c0_i32 = arith.constant 0 : i32
    %c0_i32_0 = arith.constant 0 : i32
    return %arg0, %c0_i32 : i32, i32
  }
}

module attributes {stable_mosaic.version = 11 : i64} {
  func.func @kernel(%arg0: i32, %arg1: i32, %arg2: memref<64x128xbf16, #tpu.memory_space<vmem>>, %arg3: memref<128x16xbf16, #tpu.memory_space<vmem>>, %arg4: memref<8x32xbf16, #tpu.memory_space<vmem>>, %arg5: memref<1x64xf32, #tpu.memory_space<vmem>>, %arg6: memref<1x1xf32, #tpu.memory_space<vmem>>, %arg7: memref<64x64xbf16, #tpu.memory_space<vmem>>, %arg8: memref<64x16xf32, #tpu.memory_space<vmem>>) attributes {dimension_semantics = [#tpu.dimension_semantics<parallel>, #tpu.dimension_semantics<arbitrary>], iteration_bounds = array<i64: 2, 1>, scalar_prefetch = 0 : i64, scratch_operands = 1 : i64, tpu.core_type = #tpu.core_type<tc>, window_params = [{transform_indices = @transform_0, window_bounds = array<i64: 64, 128>}, {transform_indices = @transform_1, window_bounds = array<i64: 128, 16>}, {pipeline_mode = #tpu.pipeline_mode<synchronous>, transform_indices = @transform_2, window_bounds = array<i64: 8, 32>}, {pipeline_mode = #tpu.pipeline_mode<synchronous>, transform_indices = @transform_3, window_bounds = array<i64: 1, 64>}, {pipeline_mode = #tpu.pipeline_mode<synchronous>, transform_indices = @transform_4, window_bounds = array<i64: 1, 1>}, {transform_indices = @transform_5, window_bounds = array<i64: 64, 64>}]} {
    %c0_i32 = arith.constant 0 : i32
    %0 = arith.cmpi eq, %arg1, %c0_i32 : i32
    %1 = arith.extui %0 : i1 to i32
    %c0_i32_0 = arith.constant 0 : i32
    %2 = arith.cmpi ne, %1, %c0_i32_0 : i32
    scf.if %2 {
      %cst_10 = arith.constant 0.000000e+00 : f32
      %12 = vector.broadcast %cst_10 : f32 to vector<64x16xf32>
      %c0_11 = arith.constant 0 : index
      %c0_12 = arith.constant 0 : index
      %13 = vector.load %arg8[%c0_11, %c0_12] : memref<64x16xf32, #tpu.memory_space<vmem>>, vector<64x16xf32>
      tpu.vector_store %arg8[%c0_11, %c0_12], %12 {strides = array<i32>} : memref<64x16xf32, #tpu.memory_space<vmem>>, vector<64x16xf32>,
    } else {
    }
    %c0 = arith.constant 0 : index
    %c0_1 = arith.constant 0 : index
    %3 = vector.load %arg8[%c0, %c0_1] : memref<64x16xf32, #tpu.memory_space<vmem>>, vector<64x16xf32>
    %c0_2 = arith.constant 0 : index
    %c0_3 = arith.constant 0 : index
    %4 = vector.load %arg2[%c0_2, %c0_3] : memref<64x128xbf16, #tpu.memory_space<vmem>>, vector<64x128xbf16>
    %c0_4 = arith.constant 0 : index
    %c0_5 = arith.constant 0 : index
    %5 = vector.load %arg3[%c0_4, %c0_5] : memref<128x16xbf16, #tpu.memory_space<vmem>>, vector<128x16xbf16>
    %cst = arith.constant dense<0.000000e+00> : vector<64x16xf32>
    %6 = tpu.matmul %4, %5, %cst {dimension_numbers = #tpu.dot_dimension_numbers<[1], [0], [0], [1], [0, 0, 1, 1], [], []>} : vector<64x128xbf16>, vector<128x16xbf16>, vector<64x16xf32> -> vector<64x16xf32>
    %7 = arith.addf %3, %6 : vector<64x16xf32>
    %c0_6 = arith.constant 0 : index
    %c0_7 = arith.constant 0 : index
    %8 = vector.load %arg8[%c0_6, %c0_7] : memref<64x16xf32, #tpu.memory_space<vmem>>, vector<64x16xf32>
    tpu.vector_store %arg8[%c0_6, %c0_7], %7 {strides = array<i32>} : memref<64x16xf32, #tpu.memory_space<vmem>>, vector<64x16xf32>,
    %c0_i32_8 = arith.constant 0 : i32
    %9 = arith.cmpi eq, %arg1, %c0_i32_8 : i32
    %10 = arith.extui %9 : i1 to i32
    %c0_i32_9 = arith.constant 0 : i32
    %11 = arith.cmpi ne, %10, %c0_i32_9 : i32
    scf.if %11 {
      %c0_10 = arith.constant 0 : index
      %c0_11 = arith.constant 0 : index
      %12 = vector.load %arg8[%c0_10, %c0_11] : memref<64x16xf32, #tpu.memory_space<vmem>>, vector<64x16xf32>
      %13 = arith.truncf %12 : vector<64x16xf32> to vector<64x16xbf16>
      %c0_12 = arith.constant 0 : index
      %c0_13 = arith.constant 0 : index
      %14 = vector.load %arg4[%c0_12, %c0_13] : memref<8x32xbf16, #tpu.memory_space<vmem>>, vector<8x32xbf16>
      %15 = vector.extract_strided_slice %13 {offsets = [0, 0], sizes = [64, 8], strides = [1, 1]} : vector<64x16xbf16> to vector<64x8xbf16>
      %cst_14 = arith.constant dense<0.000000e+00> : vector<64x32xf32>
      %16 = tpu.matmul %15, %14, %cst_14 {dimension_numbers = #tpu.dot_dimension_numbers<[1], [0], [0], [1], [0, 0, 1, 1], [], []>} : vector<64x8xbf16>, vector<8x32xbf16>, vector<64x32xf32> -> vector<64x32xf32>
      %17 = vector.extract_strided_slice %13 {offsets = [0, 8], sizes = [64, 8], strides = [1, 1]} : vector<64x16xbf16> to vector<64x8xbf16>
      %cst_15 = arith.constant dense<0.000000e+00> : vector<64x32xf32>
      %18 = tpu.matmul %17, %14, %cst_15 {dimension_numbers = #tpu.dot_dimension_numbers<[1], [0], [0], [1], [0, 0, 1, 1], [], []>} : vector<64x8xbf16>, vector<8x32xbf16>, vector<64x32xf32> -> vector<64x32xf32>
      %19 = tpu.concatenate %16, %18 in 1 : vector<64x32xf32>, vector<64x32xf32> -> vector<64x64xf32>
      %c0_16 = arith.constant 0 : index
      %c0_17 = arith.constant 0 : index
      %20 = vector.load %arg5[%c0_16, %c0_17] : memref<1x64xf32, #tpu.memory_space<vmem>>, vector<1x64xf32>
      %21 = vector.broadcast %20 : vector<1x64xf32> to vector<64x64xf32>
      %22 = arith.addf %19, %21 : vector<64x64xf32>
      %cst_18 = arith.constant 0.000000e+00 : f32
      %23 = vector.broadcast %cst_18 : f32 to vector<64x64xf32>
      %24 = arith.cmpf ogt, %22, %23 : vector<64x64xf32>
      %c0_19 = arith.constant 0 : index
      %c0_20 = arith.constant 0 : index
      %25 = vector.load %arg6[%c0_19, %c0_20] : memref<1x1xf32, #tpu.memory_space<vmem>>, vector<1x1xf32>
      %26 = vector.broadcast %25 : vector<1x1xf32> to vector<64x64xf32>
      %27 = arith.mulf %26, %22 : vector<64x64xf32>
      %28 = arith.select %24, %22, %27 : vector<64x64xi1>, vector<64x64xf32>
      %29 = arith.truncf %28 : vector<64x64xf32> to vector<64x64xbf16>
      %c0_21 = arith.constant 0 : index
      %c0_22 = arith.constant 0 : index
      %30 = vector.load %arg7[%c0_21, %c0_22] : memref<64x64xbf16, #tpu.memory_space<vmem>>, vector<64x64xbf16>
      tpu.vector_store %arg7[%c0_21, %c0_22], %29 {strides = array<i32>} : memref<64x64xbf16, #tpu.memory_space<vmem>>, vector<64x64xbf16>,
    } else {
    }
    return
  }
  func.func @transform_0(%arg0: i32, %arg1: i32) -> (i32, i32) {
    %c0_i32 = arith.constant 0 : i32
    return %arg0, %arg1 : i32, i32
  }
  func.func @transform_1(%arg0: i32, %arg1: i32) -> (i32, i32) {
    %c0_i32 = arith.constant 0 : i32
    %c0_i32_0 = arith.constant 0 : i32
    return %arg1, %c0_i32 : i32, i32
  }
  func.func @transform_2(%arg0: i32, %arg1: i32) -> (i32, i32) {
    %c0_i32 = arith.constant 0 : i32
    %c0_i32_0 = arith.constant 0 : i32
    %c0_i32_1 = arith.constant 0 : i32
    return %c0_i32, %c0_i32_0 : i32, i32
  }
  func.func @transform_3(%arg0: i32, %arg1: i32) -> (i32, i32) {
    %c0_i32 = arith.constant 0 : i32
    %c0_i32_0 = arith.constant 0 : i32
    %c0_i32_1 = arith.constant 0 : i32
    return %c0_i32, %c0_i32_0 : i32, i32
  }
  func.func @transform_4(%arg0: i32, %arg1: i32) -> (i32, i32) {
    %c0_i32 = arith.constant 0 : i32
    %c0_i32_0 = arith.constant 0 : i32
    %c0_i32_1 = arith.constant 0 : i32
    return %c0_i32, %c0_i32_0 : i32, i32
  }
  func.func @transform_5(%arg0: i32, %arg1: i32) -> (i32, i32) {
    %c0_i32 = arith.constant 0 : i32
    %c0_i32_0 = arith.constant 0 : i32
    return %arg0, %c0_i32 : i32, i32
  }
}

module attributes {stable_mosaic.version = 11 : i64} {
  func.func @_disc_kernel(%arg0: i32, %arg1: memref<128x64xbf16, #tpu.memory_space<vmem>>, %arg2: memref<128x64xbf16, #tpu.memory_space<vmem>>, %arg3: memref<64x4xbf16, #tpu.memory_space<vmem>>, %arg4: memref<64x4xbf16, #tpu.memory_space<vmem>>, %arg5: memref<1x1xf32, #tpu.memory_space<vmem>>, %arg6: memref<128x4xf32, #tpu.memory_space<vmem>>) attributes {dimension_semantics = [#tpu.dimension_semantics<parallel>], iteration_bounds = array<i64: 1>, scalar_prefetch = 0 : i64, scratch_operands = 0 : i64, tpu.core_type = #tpu.core_type<tc>, window_params = [{transform_indices = @transform_0, window_bounds = array<i64: 128, 64>}, {transform_indices = @transform_1, window_bounds = array<i64: 128, 64>}, {pipeline_mode = #tpu.pipeline_mode<synchronous>, transform_indices = @transform_2, window_bounds = array<i64: 64, 4>}, {pipeline_mode = #tpu.pipeline_mode<synchronous>, transform_indices = @transform_3, window_bounds = array<i64: 64, 4>}, {pipeline_mode = #tpu.pipeline_mode<synchronous>, transform_indices = @transform_4, window_bounds = array<i64: 1, 1>}, {transform_indices = @transform_5, window_bounds = array<i64: 128, 4>}]} {
    %c0 = arith.constant 0 : index
    %c0_0 = arith.constant 0 : index
    %0 = vector.load %arg1[%c0, %c0_0] : memref<128x64xbf16, #tpu.memory_space<vmem>>, vector<128x64xbf16>
    %c0_1 = arith.constant 0 : index
    %c0_2 = arith.constant 0 : index
    %1 = vector.load %arg3[%c0_1, %c0_2] : memref<64x4xbf16, #tpu.memory_space<vmem>>, vector<64x4xbf16>
    %cst = arith.constant dense<0.000000e+00> : vector<128x4xf32>
    %2 = tpu.matmul %0, %1, %cst {dimension_numbers = #tpu.dot_dimension_numbers<[1], [0], [0], [1], [0, 0, 1, 1], [], []>} : vector<128x64xbf16>, vector<64x4xbf16>, vector<128x4xf32> -> vector<128x4xf32>
    %c0_3 = arith.constant 0 : index
    %c0_4 = arith.constant 0 : index
    %3 = vector.load %arg2[%c0_3, %c0_4] : memref<128x64xbf16, #tpu.memory_space<vmem>>, vector<128x64xbf16>
    %c0_5 = arith.constant 0 : index
    %c0_6 = arith.constant 0 : index
    %4 = vector.load %arg4[%c0_5, %c0_6] : memref<64x4xbf16, #tpu.memory_space<vmem>>, vector<64x4xbf16>
    %cst_7 = arith.constant dense<0.000000e+00> : vector<128x4xf32>
    %5 = tpu.matmul %3, %4, %cst_7 {dimension_numbers = #tpu.dot_dimension_numbers<[1], [0], [0], [1], [0, 0, 1, 1], [], []>} : vector<128x64xbf16>, vector<64x4xbf16>, vector<128x4xf32> -> vector<128x4xf32>
    %6 = arith.addf %2, %5 : vector<128x4xf32>
    %c0_8 = arith.constant 0 : index
    %c0_9 = arith.constant 0 : index
    %7 = vector.load %arg5[%c0_8, %c0_9] : memref<1x1xf32, #tpu.memory_space<vmem>>, vector<1x1xf32>
    %8 = vector.broadcast %7 : vector<1x1xf32> to vector<128x4xf32>
    %9 = arith.addf %6, %8 : vector<128x4xf32>
    %c0_10 = arith.constant 0 : index
    %c0_11 = arith.constant 0 : index
    %10 = vector.load %arg6[%c0_10, %c0_11] : memref<128x4xf32, #tpu.memory_space<vmem>>, vector<128x4xf32>
    tpu.vector_store %arg6[%c0_10, %c0_11], %9 {strides = array<i32>} : memref<128x4xf32, #tpu.memory_space<vmem>>, vector<128x4xf32>,
    return
  }
  func.func @transform_0(%arg0: i32) -> (i32, i32) {
    %c0_i32 = arith.constant 0 : i32
    %c0_i32_0 = arith.constant 0 : i32
    return %arg0, %c0_i32 : i32, i32
  }
  func.func @transform_1(%arg0: i32) -> (i32, i32) {
    %c0_i32 = arith.constant 0 : i32
    %c0_i32_0 = arith.constant 0 : i32
    return %arg0, %c0_i32 : i32, i32
  }
  func.func @transform_2(%arg0: i32) -> (i32, i32) {
    %c0_i32 = arith.constant 0 : i32
    %c0_i32_0 = arith.constant 0 : i32
    %c0_i32_1 = arith.constant 0 : i32
    return %c0_i32, %c0_i32_0 : i32, i32
  }
  func.func @transform_3(%arg0: i32) -> (i32, i32) {
    %c0_i32 = arith.constant 0 : i32
    %c0_i32_0 = arith.constant 0 : i32
    %c0_i32_1 = arith.constant 0 : i32
    return %c0_i32, %c0_i32_0 : i32, i32
  }
  func.func @transform_4(%arg0: i32) -> (i32, i32) {
    %c0_i32 = arith.constant 0 : i32
    %c0_i32_0 = arith.constant 0 : i32
    %c0_i32_1 = arith.constant 0 : i32
    return %c0_i32, %c0_i32_0 : i32, i32
  }
  func.func @transform_5(%arg0: i32) -> (i32, i32) {
    %c0_i32 = arith.constant 0 : i32
    %c0_i32_0 = arith.constant 0 : i32
    return %arg0, %c0_i32 : i32, i32
  }
}

</mosaic_0001>

<bundles_post_ra>
// kernel: ssl_forward.3
= control target key start
LH: loop header
LB: loop body
LE: loop exit
PB: predicated region body
PF: predicated region fallthrough
CT: control target
= control target key end

     0   :  { %s1221_s23 = smov 0   ;;  %s1223_s24 = smov 0   ;;  %s1367_s0 = inlined_call_operand.vmem [shape: bf16[128,128], index: 0, kind: input, shape index: {}]   ;;  %s1368_s1 = inlined_call_operand.vmem [shape: f32[128,1], index: 1, kind: input, shape index: {}]   ;;  %s1369_s2 = inlined_call_operand.vmem [shape: bf16[128,16], index: 2, kind: input, shape index: {}]   ;;  %s1370_s3 = inlined_call_operand.vmem [shape: bf16[8,32], index: 3, kind: input, shape index: {}]   ;;  %s1371_s4 = inlined_call_operand.vmem [shape: f32[1,64], index: 4, kind: input, shape index: {}]   ;;  %s1372_s5 = inlined_call_operand.<no memory space> [shape: f32[1,1], index: 5, kind: input, shape index: {}]   ;;  %s1373_s6 = inlined_call_operand.vmem [shape: bf16[128,64], index: 6, kind: output, shape index: {}]  }
   0x1   :  { %v11_v0 = vstv %s1372_s5  ;;  %s1225_s25 = smov 0  }
   0x2   :  { %12 = vst [vmem:[#allocation3] sm:$0x1] %v11_v0 }
   0x3 LB: > { %s30_s5 = sadd.s32 1, %s1173_s24  ;;  %p998_p0 = scmp.ge.s32.totalorder %s1177_s25, 1  ;;  %s1177_s25 = sphi %s1225_s25, %s18_s25   ;;  %s1173_s24 = sphi %s1223_s24, %s1375_s24   ;;  %s1169_s23 = sphi %s1221_s23, %s1374_s23  }
   0x4   : > { %p32_p1 = scmp.ge.s32.totalorder %s30_s5, 2  ;;  %p254_p2 = scmp.lt.s32.totalorder %s1177_s25, 3 }
   0x6   : > { %s1377_s5 = smov (%p32_p1, %s30_s5), 0  ;;  %p255_p3 = pnand %p998_p0, %p254_p2 }
   0x7   : > { %v1143_v1 = vld [vmem:[%s1369_s2] sm:$0xff] (!%p255_p3)   ;;  %s999_s28 = sshll.u32 (!%p255_p3), %s1169_s23, 3  ;;  %v1144_v2 = vld [vmem:[%s1369_s2 + $0x8] sm:$0xff] (!%p255_p3)   ;;  %v1179_v3 = vmov (!%p255_p3), 0   ;;  %v1145_v4 = vld [vmem:[%s1369_s2 + $0x10] sm:$0xff] (!%p255_p3)   ;;  %vm329_vm0 = vcmask (!%p255_p3), 130048  }
   0x8   : > { %258 = sbr.rel (%p255_p3) target bundleno = 736 (0x2e0), region = 44  ;;  %p298_p4 = scmp.lt.s32.totalorder (!%p255_p3), %s999_s28, 15  ;;  %1067 = vmatprep.subr.bf16.mxu0 (!%p255_p3), %v1143_v1  ;;  %1141 = vset.pattern.permute.xlu0 (!%p255_p3), %v1179_v3  ;;  %v1146_v5 = vld [vmem:[%s1369_s2 + $0x18] sm:$0xff] (!%p255_p3)   ;;  %v1147_v7 = vld [vmem:[%s1369_s2 + $0x20] sm:$0xff] (!%p255_p3)   ;;  %v1180_v10 = vmov (!%p255_p3), 0.0   ;;  %v1148_v13 = vld [vmem:[%s1369_s2 + $0x28] sm:$0xff] (!%p255_p3)  }
   0x9   : > { %1068 = vmatpush3.bf16.msra.mxu0 (!%p255_p3), %v1143_v1  ;;  %1142 = vset.pattern.permute.xlu1 (!%p255_p3), %v1179_v3  ;;  %332 = vst.msk [vmem:[#allocation2 + $0x10] sm:$0xff] (!%p255_p3), %vm329_vm0, %v1180_v10  ;;  %330 = vst.msk [vmem:[#allocation2] sm:$0xff] (!%p255_p3), %vm329_vm0, %v1180_v10  ;;  %v1149_v16 = vld [vmem:[%s1369_s2 + $0x30] sm:$0xff] (!%p255_p3)   ;;  %v1150_v19 = vld [vmem:[%s1369_s2 + $0x38] sm:$0xff] (!%p255_p3)   ;;  %vm609_vm1 = vcmask (!%p255_p3), 1043456   ;;  %vm596_vm2 = vcmask (!%p255_p3), 64512  }
   0xa   : > { %1069 = vmatprep.subr.bf16.mxu0 (!%p255_p3), %v1144_v2  ;;  %331 = vst.msk [vmem:[#allocation2 + $0x8] sm:$0xff] (!%p255_p3), %vm329_vm0, %v1180_v10  ;;  %333 = vst.msk [vmem:[#allocation2 + $0x18] sm:$0xff] (!%p255_p3), %vm329_vm0, %v1180_v10  ;;  %v595_v23 = vld [vmem:[%s1370_s3] sm:$0xf] (!%p255_p3)  ;;  %s1181_s8 = smov (!%p255_p3), 120   ;;  %s1182_s10 = smov (!%p255_p3), 32  }
   0xb   : > { %334 = vst.msk [vmem:[#allocation2 + $0x20] sm:$0xff] (!%p255_p3), %vm329_vm0, %v1180_v10  ;;  %335 = vst.msk [vmem:[#allocation2 + $0x28] sm:$0xff] (!%p255_p3), %vm329_vm0, %v1180_v10  ;;  %1111 = vmatprep.subr.msk.bf16.mxu1 (!%p255_p3), %vm609_vm1, %v595_v23  ;;  %v611_v24 = vsel (!%p255_p3), %vm609_vm1, %v595_v23, 0  ;;  %vm799_vm3 = vcmask (!%p255_p3), 261120   ;;  %vm889_vm5 = vcmask (!%p255_p3), 519168  }
   0xc   : > { %336 = vst.msk [vmem:[#allocation2 + $0x30] sm:$0xff] (!%p255_p3), %vm329_vm0, %v1180_v10  ;;  %337 = vst.msk [vmem:[#allocation2 + $0x38] sm:$0xff] (!%p255_p3), %vm329_vm0, %v1180_v10  ;;  %1092 = vmatpush3.bf16.msra.mxu1 (!%p255_p3), %v611_v24 }
   0xd   : > { %1070 = vmatpush3.bf16.msra.mxu0 (!%p255_p3), %v1144_v2  ;;  %1112 = vmatprep.subr.msk.bf16.mxu1 (!%p255_p3), %vm609_vm1, %v595_v23 }
   0xe   : > { %1071 = vmatprep.subr.bf16.mxu0 (!%p255_p3), %v1145_v4 }
   0xf   : > { %s1379_s28 = smov (!%p298_p4, %s999_s28), 15 }
  0x10   : > { %s1000_s9 = sshll.u32 %s1379_s28, 2  ;;  %s1002_s15 = sshll.u32 %s1379_s28, 3  ;;  %v340_v25 = vld [vmem:[#allocation2 + $0x10] sm:$0xff]  ;;  %v338_v26 = vld [vmem:[#allocation2] sm:$0xff] }
  0x11   : > { %s1256_s12 = scalar_lea.vmem %s1367_s0, %s1000_s9  ;;  %s1266_s18 = scalar_lea.vmem %s1368_s1, %s1002_s15  ;;  %1072 = vmatpush3.bf16.msra.mxu0 %v1145_v4  ;;  %v341_v28 = vld [vmem:[#allocation2 + $0x18] sm:$0xff]  ;;  %v339_v32 = vld [vmem:[#allocation2 + $0x8] sm:$0xff] }
  0x12   : > { %v1151_v6 = vld [vmem:[%s1256_s12] sm:$0xff]   ;;  %1073 = vmatprep.subr.bf16.mxu0 %v1146_v5  ;;  %v537_v9 = vld [vmem:[%s1266_s18 + $0x10] sm:$0xff]  ;;  %v536_v11 = vld [vmem:[%s1266_s18 + $0x8] sm:$0xff]  ;;  %s1333_s15 = scalar_lea.vmem %s1373_s6, %s1000_s9 }
  0x13   : > { %1083 = vmatprep.mubr.bf16.mxu0 %v1151_v6  ;;  %v535_v8 = vld [vmem:[%s1266_s18] sm:$0xff]  ;;  %555 = vperm.xlu1 %1142, %v537_v9   ;;  %v538_v12 = vld [vmem:[%s1266_s18 + $0x18] sm:$0xff]  ;;  %v540_v15 = vld [vmem:[%s1266_s18 + $0x28] sm:$0xff] }
  0x14   : > { %545 = vperm.xlu0 %1141, %v535_v8   ;;  %v539_v14 = vld [vmem:[%s1266_s18 + $0x20] sm:$0xff]  ;;  %v541_v17 = vld [vmem:[%s1266_s18 + $0x30] sm:$0xff]  ;;  %v542_v18 = vld [vmem:[%s1266_s18 + $0x38] sm:$0xff] }
  0x15   : > { %1074 = vmatpush3.bf16.msra.mxu0 %v1146_v5  ;;  %v1152_v20 = vld [vmem:[%s1256_s12 + $0x8] sm:$0xff]   ;;  %v1153_v21 = vld [vmem:[%s1256_s12 + $0x10] sm:$0xff]   ;;  %v1154_v22 = vld [vmem:[%s1256_s12 + $0x18] sm:$0xff]  }
  0x16   : > { %1075 = vmatprep.subr.bf16.mxu0 %v1147_v7  ;;  %v344_v39 = vld [vmem:[#allocation2 + $0x30] sm:$0xff]  ;;  %v342_v41 = vld [vmem:[#allocation2 + $0x20] sm:$0xff]  ;;  %v345_v44 = vld [vmem:[#allocation2 + $0x38] sm:$0xff] }
  0x17   : > { %560 = vperm.xlu1 %1142, %v538_v12   ;;  %v343_v47 = vld [vmem:[#allocation2 + $0x28] sm:$0xff] }
  0x18   : > { %550 = vperm.xlu0 %1141, %v536_v11  }
  0x19   : > { %1076 = vmatpush3.bf16.msra.mxu0 %v1147_v7 }
  0x1a   : > { %1077 = vmatprep.subr.bf16.mxu0 %v1148_v13 }
  0x1b   : > { %570 = vperm.xlu1 %1142, %v540_v15  }
  0x1c   : > { %565 = vperm.xlu0 %1141, %v539_v14  }
  0x1d   : > { %1078 = vmatpush3.bf16.msra.mxu0 %v1148_v13  ;;  %v1026_v13 = vld [vmem:[#allocation3] ss:$0 sm:$0xff] }
  0x1e   : > { %1079 = vmatprep.subr.bf16.mxu0 %v1149_v16 }
  0x1f   : > { %580 = vperm.xlu1 %1142, %v542_v18  }
  0x20   : > { %575 = vperm.xlu0 %1141, %v541_v17  }
  0x21   : > { %1080 = vmatpush3.bf16.msra.mxu0 %v1149_v16 }
  0x22   : > { %1081 = vmatprep.subr.bf16.mxu0 %v1150_v19 }
  0x25   : > { %1082 = vmatpush3.bf16.msra.mxu0 %v1150_v19 }
  0x28   : > { %1084 = vmatmul.mubr.bf16.vlgmr.msra.gmra.mrb[0].mxu0 %v1152_v20 }
  0x29   : > { %1087 = vmatprep.mubr.bf16.mxu0 %v1153_v21 }
  0x30   : > { %1088 = vmatmul.mubr.bf16.gmra.mrb[4].mxu0 %v1154_v22 }
  0x92   : > { %v556_v33 = vpop.permute.xlu1 %555 }
  0x93   : > { %v546_v29 = vpop.permute.xlu0 %545 }
  0x96   : > { %v561_v42 = vpop.permute.xlu1 %560 }
  0x97   : > { %v551_v40 = vpop.permute.xlu0 %550 }
  0x9a   : > { %v571_v60 = vpop.permute.xlu1 %570 }
  0x9b   : > { %v566_v59 = vpop.permute.xlu0 %565 }
  0x9e   : > { %v581_v4 = vpop.permute.xlu1 %580 }
  0x9f   : > { %v576_v3 = vpop.permute.xlu0 %575 }
  0xfb   : > { %v1085_v27 = vpop.f32.mrb[0].mxu0 }
  0xfc   : > { %v509_v30 = vadd.f32 %v1085_v27, %v340_v25  ;;  %v476_v31 = vpop.f32.mrb[1].mxu0 }
  0xfd   : > { %v507_v34 = vadd.f32 %v476_v31, %v338_v26  ;;  %v1086_v35 = vpop.f32.mrb[2].mxu0 }
  0xfe   : > { %518 = vst.msk [vmem:[#allocation2 + $0x10] sm:$0xff] %vm329_vm0, %v509_v30  ;;  %v510_v36 = vadd.f32 %v1086_v35, %v341_v28  ;;  %v479_v37 = vpop.f32.mrb[3].mxu0  ;;  %v1025_v35 = vld [vmem:[%s1371_s4] ss:$0 sm:$0xff] }
  0xff   : > { %516 = vst.msk [vmem:[#allocation2] sm:$0xff] %vm329_vm0, %v507_v34  ;;  %v508_v38 = vadd.f32 %v479_v37, %v339_v32 }
 0x100   : > { %519 = vst.msk [vmem:[#allocation2 + $0x18] sm:$0xff] %vm329_vm0, %v510_v36 }
 0x101   : > { %517 = vst.msk [vmem:[#allocation2 + $0x8] sm:$0xff] %vm329_vm0, %v508_v38 }
 0x103   : > { %v1089_v43 = vpop.f32.mrb[4].mxu0 }
 0x104   : > { %v513_v45 = vadd.f32 %v1089_v43, %v344_v39  ;;  %v492_v46 = vpop.f32.mrb[5].mxu0 }
 0x105   : > { %v511_v48 = vadd.f32 %v492_v46, %v342_v41  ;;  %v1090_v49 = vpop.f32.mrb[6].mxu0  ;;  %v529_v50 = vld [vmem:[#allocation2 + $0x10] sm:$0xff] }
 0x106   : > { %522 = vst.msk [vmem:[#allocation2 + $0x30] sm:$0xff] %vm329_vm0, %v513_v45  ;;  %v514_v51 = vadd.f32 %v1090_v49, %v345_v44  ;;  %v495_v52 = vpop.f32.mrb[7].mxu0  ;;  %v527_v53 = vld [vmem:[#allocation2] sm:$0xff]  ;;  %v585_v56 = vmul.f32 %v556_v33, %v529_v50 }
 0x107   : > { %520 = vst.msk [vmem:[#allocation2 + $0x20] sm:$0xff] %vm329_vm0, %v511_v48  ;;  %v512_v54 = vadd.f32 %v495_v52, %v343_v47  ;;  %v530_v55 = vld [vmem:[#allocation2 + $0x18] sm:$0xff]  ;;  %v583_v61 = vmul.f32 %v546_v29, %v527_v53 }
 0x108   : > { %523 = vst.msk [vmem:[#allocation2 + $0x38] sm:$0xff] %vm329_vm0, %v514_v51  ;;  %v586_v57 = vmul.f32 %v561_v42, %v530_v55  ;;  %v528_v58 = vld [vmem:[#allocation2 + $0x8] sm:$0xff] }
 0x109   : > { %521 = vst.msk [vmem:[#allocation2 + $0x28] sm:$0xff] %vm329_vm0, %v512_v54  ;;  %v584_v62 = vmul.f32 %v551_v40, %v528_v58 }
 0x10a   : > { %v592_v63 = vpack.c.bf16 %v586_v57, %v585_v56 }
 0x10b   : > { %v591_v0 = vpack.c.bf16 %v584_v62, %v583_v61 }
 0x10c   : > { %684 = vrot.lane.b32.xlu1 %v592_v63, %s1181_s8 }
 0x10d   : > { %v533_v1 = vld [vmem:[#allocation2 + $0x30] sm:$0xff]  ;;  %682 = vrot.lane.b32.xlu0 %v591_v0, %s1181_s8  ;;  %1093 = vmatprep.mubr.msk.bf16.mxu1 %vm596_vm2, %v591_v0 }
 0x10e   : > { %1094 = vmatmul.mubr.msk.bf16.vlgmr.msra.gmra.mrb[0].mxu1 %vm596_vm2, %v592_v63  ;;  %v531_v2 = vld [vmem:[#allocation2 + $0x20] sm:$0xff]  ;;  %v589_v6 = vmul.f32 %v576_v3, %v533_v1 }
 0x10f   : > { %v534_v5 = vld [vmem:[#allocation2 + $0x38] sm:$0xff]  ;;  %1102 = vmatpush3.bf16.msra.mxu1 %v611_v24  ;;  %v587_v9 = vmul.f32 %v566_v59, %v531_v2 }
 0x110   : > { %v590_v7 = vmul.f32 %v581_v4, %v534_v5  ;;  %v532_v8 = vld [vmem:[#allocation2 + $0x28] sm:$0xff] }
 0x111   : > { %v588_v10 = vmul.f32 %v571_v60, %v532_v8 }
 0x112   : > { %v594_v11 = vpack.c.bf16 %v590_v7, %v589_v6 }
 0x113   : > { %v593_v12 = vpack.c.bf16 %v588_v10, %v587_v9 }
 0x114   : > { %688 = vrot.lane.b32.xlu1 %v594_v11, %s1181_s8 }
 0x115   : > { %686 = vrot.lane.b32.xlu0 %v593_v12, %s1181_s8  ;;  %1097 = vmatprep.mubr.msk.bf16.mxu1 %vm596_vm2, %v593_v12 }
 0x116   : > { %1098 = vmatmul.mubr.msk.bf16.gmra.mrb[4].mxu1 %vm596_vm2, %v594_v11 }
 0x119   : > { %838 = vperm.xlu0 %1141, %v1026_v13  }
 0x17e   : > { %v685_v15 = vpop.permute.xlu1 %684 }
 0x17f   : > { %v683_v14 = vpop.permute.xlu0 %682 }
 0x180   : > { %1103 = vmatprep.mubr.msk.bf16.mxu1 %vm596_vm2, %v683_v14 }
 0x181   : > { %1104 = vmatmul.mubr.msk.bf16.vlgmr.msra.gmra.mrb[8].mxu1 %vm596_vm2, %v685_v15 }
 0x186   : > { %v689_v17 = vpop.permute.xlu1 %688 }
 0x187   : > { %v687_v16 = vpop.permute.xlu0 %686 }
 0x188   : > { %1107 = vmatprep.mubr.msk.bf16.mxu1 %vm596_vm2, %v687_v16 }
 0x189   : > { %1108 = vmatmul.mubr.msk.bf16.gmra.mrb[12].mxu1 %vm596_vm2, %v689_v17 }
 0x198   : > { %v839_v34 = vpop.permute.xlu0 %838 }
 0x1e1   : > { %v1095_v18 = vpop.f32.mrb[0].mxu1 }
 0x1e2   : > { %v647_v19 = vpop.f32.mrb[1].mxu1 }
 0x1e3   : > { %v1096_v20 = vpop.f32.mrb[2].mxu1 }
 0x1e4   : > { %v650_v21 = vpop.f32.mrb[3].mxu1 }
 0x1e9   : > { %v1318_v22 = vpop.f32.mrb[4].mxu1 }
 0x1ea   : > { %v663_v23 = vpop.f32.mrb[5].mxu1 }
 0x1eb   : > { %v1320_v24 = vpop.f32.mrb[6].mxu1 }
 0x1ec   : > { %v666_v25 = vpop.f32.mrb[7].mxu1 }
 0x254   : > { %v1105_v26 = vpop.f32.mrb[8].mxu1 }
 0x255   : > { %779 = vrot.lane.b32.xlu1 %v1105_v26, %s1182_s10  ;;  %v736_v27 = vpop.f32.mrb[9].mxu1 }
 0x256   : > { %v1106_v28 = vpop.f32.mrb[10].mxu1 }
 0x257   : > { %781 = vrot.lane.b32.xlu0 %v1106_v28, %s1182_s10  ;;  %v739_v29 = vpop.f32.mrb[11].mxu1 }
 0x259   : > { %775 = vrot.lane.b32.xlu1 %v736_v27, %s1182_s10 }
 0x25b   : > { %777 = vrot.lane.b32.xlu0 %v739_v29, %s1182_s10 }
 0x25c   : > { %v1109_v30 = vpop.f32.mrb[12].mxu1 }
 0x25d   : > { %v752_v31 = vpop.f32.mrb[13].mxu1 }
 0x25e   : > { %783 = vrot.lane.b32.xlu1 %v752_v31, %s1182_s10  ;;  %v1110_v32 = vpop.f32.mrb[14].mxu1 }
 0x25f   : > { %v755_v33 = vpop.f32.mrb[15].mxu1 }
 0x260   : > { %785 = vrot.lane.b32.xlu0 %v755_v33, %s1182_s10 }
 0x262   : > { %787 = vrot.lane.b32.xlu1 %v1109_v30, %s1182_s10 }
 0x264   : > { %789 = vrot.lane.b32.xlu0 %v1110_v32, %s1182_s10 }
 0x2c7   : > { %v780_v36 = vpop.permute.xlu1 %779 }
 0x2c8   : > { %v802_v37 = vsel %vm799_vm3, %v1095_v18, %v780_v36 }
 0x2c9   : > { %v817_v38 = vadd.f32 %v1025_v35, %v802_v37  ;;  %v782_v39 = vpop.permute.xlu0 %781 }
 0x2ca   : > { %v803_v40 = vsel %vm799_vm3, %v1096_v20, %v782_v39 }
 0x2cb   : > { %vm825_vm4 = vcmp.gt.f32.partialorder %v817_v38, 0.0  ;;  %v843_v41 = vmul.f32 %v839_v34, %v817_v38  ;;  %v818_v42 = vadd.f32 %v1025_v35, %v803_v40  ;;  %v776_v43 = vpop.permute.xlu1 %775 }
 0x2cc   : > { %v800_v44 = vsel %vm799_vm3, %v647_v19, %v776_v43 }
 0x2cd   : > { %v851_v45 = vsel %vm825_vm4, %v817_v38, %v843_v41  ;;  %vm826_vm6 = vcmp.gt.f32.partialorder %v818_v42, 0.0  ;;  %v844_v46 = vmul.f32 %v839_v34, %v818_v42  ;;  %v815_v47 = vadd.f32 %v1025_v35, %v800_v44  ;;  %v778_v48 = vpop.permute.xlu0 %777 }
 0x2ce   : > { %v1039_v49 = vpack.c.bf16 %v851_v45, %v851_v45  ;;  %v801_v50 = vsel %vm799_vm3, %v650_v21, %v778_v48 }
 0x2cf   : > { %v852_v51 = vsel %vm826_vm6, %v818_v42, %v844_v46  ;;  %vm823_vm7 = vcmp.gt.f32.partialorder %v815_v47, 0.0  ;;  %v841_v52 = vmul.f32 %v839_v34, %v815_v47  ;;  %v816_v53 = vadd.f32 %v1025_v35, %v801_v50 }
 0x2d0   : > { %892 = vst.msk [vmem:[%s1333_s15 + $0x8] sm:$0xf] %vm889_vm5, %v1039_v49  ;;  %v1040_v54 = vpack.c.bf16 %v852_v51, %v852_v51  ;;  %v784_v55 = vpop.permute.xlu1 %783 }
 0x2d1   : > { %v849_v56 = vsel %vm823_vm7, %v815_v47, %v841_v52  ;;  %vm824_vm8 = vcmp.gt.f32.partialorder %v816_v53, 0.0  ;;  %v842_v57 = vmul.f32 %v839_v34, %v816_v53  ;;  %v804_v58 = vsel %vm799_vm3, %v663_v23, %v784_v55 }
 0x2d2   : > { %893 = vst.msk [vmem:[%s1333_s15 + $0xc] sm:$0xf] %vm889_vm5, %v1040_v54  ;;  %v1037_v59 = vpack.c.bf16 %v849_v56, %v849_v56  ;;  %v819_v60 = vadd.f32 %v1025_v35, %v804_v58  ;;  %v786_v61 = vpop.permute.xlu0 %785 }
 0x2d3   : > { %v850_v62 = vsel %vm824_vm8, %v816_v53, %v842_v57  ;;  %v805_v63 = vsel %vm799_vm3, %v666_v25, %v786_v61 }
 0x2d4   : > { %890 = vst.msk [vmem:[%s1333_s15] sm:$0xf] %vm889_vm5, %v1037_v59  ;;  %v1038_v0 = vpack.c.bf16 %v850_v62, %v850_v62  ;;  %vm827_vm9 = vcmp.gt.f32.partialorder %v819_v60, 0.0  ;;  %v845_v1 = vmul.f32 %v839_v34, %v819_v60  ;;  %v820_v2 = vadd.f32 %v1025_v35, %v805_v63  ;;  %v788_v3 = vpop.permute.xlu1 %787 }
 0x2d5   : > { %v806_v4 = vsel %vm799_vm3, %v1318_v22, %v788_v3 }
 0x2d6   : > { %891 = vst.msk [vmem:[%s1333_s15 + $0x4] sm:$0xf] %vm889_vm5, %v1038_v0  ;;  %v853_v5 = vsel %vm827_vm9, %v819_v60, %v845_v1  ;;  %vm828_vm10 = vcmp.gt.f32.partialorder %v820_v2, 0.0  ;;  %v846_v6 = vmul.f32 %v839_v34, %v820_v2  ;;  %v821_v7 = vadd.f32 %v1025_v35, %v806_v4  ;;  %v790_v8 = vpop.permute.xlu0 %789 }
 0x2d7   : > { %v1041_v9 = vpack.c.bf16 %v853_v5, %v853_v5  ;;  %v807_v10 = vsel %vm799_vm3, %v1320_v24, %v790_v8 }
 0x2d8   : > { %v854_v11 = vsel %vm828_vm10, %v820_v2, %v846_v6  ;;  %vm829_vm11 = vcmp.gt.f32.partialorder %v821_v7, 0.0  ;;  %v847_v12 = vmul.f32 %v839_v34, %v821_v7  ;;  %v822_v13 = vadd.f32 %v1025_v35, %v807_v10 }
 0x2d9   : > { %894 = vst.msk [vmem:[%s1333_s15 + $0x10] sm:$0xf] %vm889_vm5, %v1041_v9  ;;  %v1042_v14 = vpack.c.bf16 %v854_v11, %v854_v11 }
 0x2da   : > { %v855_v15 = vsel %vm829_vm11, %v821_v7, %v847_v12  ;;  %vm830_vm12 = vcmp.gt.f32.partialorder %v822_v13, 0.0  ;;  %v848_v16 = vmul.f32 %v839_v34, %v822_v13 }
 0x2db   : > { %895 = vst.msk [vmem:[%s1333_s15 + $0x14] sm:$0xf] %vm889_vm5, %v1042_v14  ;;  %v1043_v17 = vpack.c.bf16 %v855_v15, %v855_v15 }
 0x2dc   : > { %v856_v18 = vsel %vm830_vm12, %v822_v13, %v848_v16 }
 0x2dd   : > { %896 = vst.msk [vmem:[%s1333_s15 + $0x18] sm:$0xf] %vm889_vm5, %v1043_v17  ;;  %v1044_v19 = vpack.c.bf16 %v856_v18, %v856_v18 }
 0x2df   : > { %897 = vst.msk [vmem:[%s1333_s15 + $0x1c] sm:$0xf] %vm889_vm5, %v1044_v19 }
 0x2e0 PF: > { %s18_s25 = sadd.s32 1, %s1177_s25   ;;  %s1374_s23 = smov %s1173_s24 }
 0x2e1   : > { %p15_p5 = scmp.ge.s32.totalorder %s18_s25, 4   ;;  %s1375_s24 = smov %s1377_s5 }
 0x2e3   :  { %17 = sbr.rel (!%p15_p5) target bundleno = 3 (0x3), region = 88 }

// kernel: ssl_forward.4
= control target key start
LH: loop header
LB: loop body
LE: loop exit
PB: predicated region body
PF: predicated region fallthrough
CT: control target
= control target key end

     0   :  { %s1096_s20 = smov 0   ;;  %s1098_s21 = smov 0   ;;  %s1232_s0 = inlined_call_operand.vmem [shape: bf16[128,128], index: 0, kind: input, shape index: {}]   ;;  %s1233_s1 = inlined_call_operand.vmem [shape: bf16[128,16], index: 1, kind: input, shape index: {}]   ;;  %s1234_s2 = inlined_call_operand.vmem [shape: bf16[8,32], index: 2, kind: input, shape index: {}]   ;;  %s1235_s3 = inlined_call_operand.vmem [shape: f32[1,64], index: 3, kind: input, shape index: {}]   ;;  %s1236_s4 = inlined_call_operand.<no memory space> [shape: f32[1,1], index: 4, kind: input, shape index: {}]   ;;  %s1237_s5 = inlined_call_operand.vmem [shape: bf16[128,64], index: 5, kind: output, shape index: {}]  }
   0x1   :  { %v10_v0 = vstv %s1236_s4  ;;  %s1100_s22 = smov 0  }
   0x2   :  { %11 = vst [vmem:[#allocation3] sm:$0x1] %v10_v0 }
   0x3 LB: > { %s29_s4 = sadd.s32 1, %s1053_s21  ;;  %p881_p0 = scmp.ge.s32.totalorder %s1057_s22, 1  ;;  %s1057_s22 = sphi %s1100_s22, %s17_s22   ;;  %s1053_s21 = sphi %s1098_s21, %s1239_s21   ;;  %s1049_s20 = sphi %s1096_s20, %s1238_s20  }
   0x4   : > { %p31_p1 = scmp.ge.s32.totalorder %s29_s4, 2  ;;  %p218_p2 = scmp.lt.s32.totalorder %s1057_s22, 3 }
   0x6   : > { %s1241_s4 = smov (%p31_p1, %s29_s4), 0  ;;  %p219_p3 = pnand %p881_p0, %p218_p2 }
   0x7   : > { %v1023_v1 = vld [vmem:[%s1233_s1] sm:$0xff] (!%p219_p3)   ;;  %s882_s25 = sshll.u32 (!%p219_p3), %s1049_s20, 3  ;;  %v1024_v2 = vld [vmem:[%s1233_s1 + $0x8] sm:$0xff] (!%p219_p3)   ;;  %vm280_vm0 = vcmask (!%p219_p3), 130048   ;;  %v1025_v3 = vld [vmem:[%s1233_s1 + $0x10] sm:$0xff] (!%p219_p3)   ;;  %v1059_v4 = vmov (!%p219_p3), 0.0  }
   0x8   : > { %222 = sbr.rel (%p219_p3) target bundleno = 739 (0x2e3), region = 40  ;;  %p255_p4 = scmp.lt.s32.totalorder (!%p219_p3), %s882_s25, 15  ;;  %948 = vmatprep.subr.bf16.mxu0 (!%p219_p3), %v1023_v1  ;;  %283 = vst.msk [vmem:[#allocation2 + $0x10] sm:$0xff] (!%p219_p3), %vm280_vm0, %v1059_v4  ;;  %281 = vst.msk [vmem:[#allocation2] sm:$0xff] (!%p219_p3), %vm280_vm0, %v1059_v4  ;;  %v1026_v5 = vld [vmem:[%s1233_s1 + $0x18] sm:$0xff] (!%p219_p3)   ;;  %v1027_v7 = vld [vmem:[%s1233_s1 + $0x20] sm:$0xff] (!%p219_p3)  }
   0x9   : > { %949 = vmatpush3.bf16.msra.mxu0 (!%p219_p3), %v1023_v1  ;;  %282 = vst.msk [vmem:[#allocation2 + $0x8] sm:$0xff] (!%p219_p3), %vm280_vm0, %v1059_v4  ;;  %284 = vst.msk [vmem:[#allocation2 + $0x18] sm:$0xff] (!%p219_p3), %vm280_vm0, %v1059_v4  ;;  %v1028_v8 = vld [vmem:[%s1233_s1 + $0x28] sm:$0xff] (!%p219_p3)   ;;  %v1029_v9 = vld [vmem:[%s1233_s1 + $0x30] sm:$0xff] (!%p219_p3)   ;;  %vm504_vm1 = vcmask (!%p219_p3), 1043456   ;;  %vm491_vm2 = vcmask (!%p219_p3), 64512  }
   0xa   : > { %950 = vmatprep.subr.bf16.mxu0 (!%p219_p3), %v1024_v2  ;;  %285 = vst.msk [vmem:[#allocation2 + $0x20] sm:$0xff] (!%p219_p3), %vm280_vm0, %v1059_v4  ;;  %286 = vst.msk [vmem:[#allocation2 + $0x28] sm:$0xff] (!%p219_p3), %vm280_vm0, %v1059_v4  ;;  %v1030_v10 = vld [vmem:[%s1233_s1 + $0x38] sm:$0xff] (!%p219_p3)   ;;  %v490_v14 = vld [vmem:[%s1234_s2] sm:$0xf] (!%p219_p3)  ;;  %s1060_s23 = smov (!%p219_p3), 120  }
   0xb   : > { %287 = vst.msk [vmem:[#allocation2 + $0x30] sm:$0xff] (!%p219_p3), %vm280_vm0, %v1059_v4  ;;  %288 = vst.msk [vmem:[#allocation2 + $0x38] sm:$0xff] (!%p219_p3), %vm280_vm0, %v1059_v4  ;;  %992 = vmatprep.subr.msk.bf16.mxu1 (!%p219_p3), %vm504_vm1, %v490_v14  ;;  %v506_v15 = vsel (!%p219_p3), %vm504_vm1, %v490_v14, 0  ;;  %v907_v52 = vld [vmem:[#allocation3] ss:$0 sm:$0xff] (!%p219_p3)  ;;  %v1061_v53 = vmov (!%p219_p3), 0  }
   0xc   : > { %973 = vmatpush3.bf16.msra.mxu1 (!%p219_p3), %v506_v15  ;;  %1022 = vset.pattern.permute.xlu0 (!%p219_p3), %v1061_v53  ;;  %s1062_s24 = smov (!%p219_p3), 32   ;;  %vm694_vm3 = vcmask (!%p219_p3), 261120   ;;  %vm784_vm6 = vcmask (!%p219_p3), 519168  }
   0xd   : > { %951 = vmatpush3.bf16.msra.mxu0 (!%p219_p3), %v1024_v2  ;;  %993 = vmatprep.subr.msk.bf16.mxu1 (!%p219_p3), %vm504_vm1, %v490_v14 }
   0xe   : > { %952 = vmatprep.subr.bf16.mxu0 (!%p219_p3), %v1025_v3 }
   0xf   : > { %s1243_s25 = smov (!%p255_p4, %s882_s25), 15  ;;  %v291_v16 = vld [vmem:[#allocation2 + $0x10] sm:$0xff]  ;;  %v289_v17 = vld [vmem:[#allocation2] sm:$0xff] }
  0x10   : > { %s883_s30 = sshll.u32 %s1243_s25, 2  ;;  %v292_v19 = vld [vmem:[#allocation2 + $0x18] sm:$0xff]  ;;  %v290_v22 = vld [vmem:[#allocation2 + $0x8] sm:$0xff] }
  0x11   : > { %s261_s8 = scalar_lea.vmem %s1232_s0, %s883_s30  ;;  %953 = vmatpush3.bf16.msra.mxu0 %v1025_v3  ;;  %v293_v29 = vld [vmem:[#allocation2 + $0x20] sm:$0xff]  ;;  %v294_v34 = vld [vmem:[#allocation2 + $0x28] sm:$0xff]  ;;  %s1191_s6 = scalar_lea.vmem %s1237_s5, %s883_s30 }
  0x12   : > { %v1031_v6 = vld [vmem:[%s261_s8] sm:$0xff]   ;;  %954 = vmatprep.subr.bf16.mxu0 %v1026_v5  ;;  %v1032_v11 = vld [vmem:[%s261_s8 + $0x8] sm:$0xff]   ;;  %v1033_v12 = vld [vmem:[%s261_s8 + $0x10] sm:$0xff]  }
  0x13   : > { %964 = vmatprep.mubr.bf16.mxu0 %v1031_v6  ;;  %v1034_v13 = vld [vmem:[%s261_s8 + $0x18] sm:$0xff]   ;;  %v295_v28 = vld [vmem:[#allocation2 + $0x30] sm:$0xff] }
  0x14   : > { %v296_v31 = vld [vmem:[#allocation2 + $0x38] sm:$0xff] }
  0x15   : > { %955 = vmatpush3.bf16.msra.mxu0 %v1026_v5 }
  0x16   : > { %956 = vmatprep.subr.bf16.mxu0 %v1027_v7 }
  0x19   : > { %957 = vmatpush3.bf16.msra.mxu0 %v1027_v7 }
  0x1a   : > { %958 = vmatprep.subr.bf16.mxu0 %v1028_v8 }
  0x1d   : > { %959 = vmatpush3.bf16.msra.mxu0 %v1028_v8 }
  0x1e   : > { %960 = vmatprep.subr.bf16.mxu0 %v1029_v9 }
  0x21   : > { %961 = vmatpush3.bf16.msra.mxu0 %v1029_v9 }
  0x22   : > { %962 = vmatprep.subr.bf16.mxu0 %v1030_v10 }
  0x25   : > { %963 = vmatpush3.bf16.msra.mxu0 %v1030_v10 }
  0x28   : > { %965 = vmatmul.mubr.bf16.vlgmr.msra.gmra.mrb[0].mxu0 %v1032_v11  ;;  %v906_v11 = vld [vmem:[%s1235_s3] ss:$0 sm:$0xff] }
  0x29   : > { %968 = vmatprep.mubr.bf16.mxu0 %v1033_v12 }
  0x30   : > { %969 = vmatmul.mubr.bf16.gmra.mrb[4].mxu0 %v1034_v13 }
  0xfb   : > { %v966_v18 = vpop.f32.mrb[0].mxu0 }
  0xfc   : > { %v460_v20 = vadd.f32 %v966_v18, %v291_v16  ;;  %v427_v21 = vpop.f32.mrb[1].mxu0 }
  0xfd   : > { %v458_v23 = vadd.f32 %v427_v21, %v289_v17  ;;  %v967_v24 = vpop.f32.mrb[2].mxu0 }
  0xfe   : > { %469 = vst.msk [vmem:[#allocation2 + $0x10] sm:$0xff] %vm280_vm0, %v460_v20  ;;  %v461_v25 = vadd.f32 %v967_v24, %v292_v19  ;;  %v430_v26 = vpop.f32.mrb[3].mxu0 }
  0xff   : > { %467 = vst.msk [vmem:[#allocation2] sm:$0xff] %vm280_vm0, %v458_v23  ;;  %v459_v27 = vadd.f32 %v430_v26, %v290_v22 }
 0x100   : > { %470 = vst.msk [vmem:[#allocation2 + $0x18] sm:$0xff] %vm280_vm0, %v461_v25 }
 0x101   : > { %468 = vst.msk [vmem:[#allocation2 + $0x8] sm:$0xff] %vm280_vm0, %v459_v27 }
 0x103   : > { %v970_v30 = vpop.f32.mrb[4].mxu0 }
 0x104   : > { %v464_v32 = vadd.f32 %v970_v30, %v295_v28  ;;  %v443_v33 = vpop.f32.mrb[5].mxu0 }
 0x105   : > { %v462_v35 = vadd.f32 %v443_v33, %v293_v29  ;;  %v971_v36 = vpop.f32.mrb[6].mxu0  ;;  %v480_v44 = vld [vmem:[#allocation2 + $0x10] sm:$0xff] }
 0x106   : > { %473 = vst.msk [vmem:[#allocation2 + $0x30] sm:$0xff] %vm280_vm0, %v464_v32  ;;  %v465_v37 = vadd.f32 %v971_v36, %v296_v31  ;;  %v446_v38 = vpop.f32.mrb[7].mxu0  ;;  %v478_v41 = vld [vmem:[#allocation2] sm:$0xff] }
 0x107   : > { %471 = vst.msk [vmem:[#allocation2 + $0x20] sm:$0xff] %vm280_vm0, %v462_v35  ;;  %v463_v39 = vadd.f32 %v446_v38, %v294_v34  ;;  %v481_v40 = vld [vmem:[#allocation2 + $0x18] sm:$0xff] }
 0x108   : > { %474 = vst.msk [vmem:[#allocation2 + $0x38] sm:$0xff] %vm280_vm0, %v465_v37  ;;  %v479_v42 = vld [vmem:[#allocation2 + $0x8] sm:$0xff]  ;;  %v487_v45 = vpack.c.bf16 %v481_v40, %v480_v44 }
 0x109   : > { %472 = vst.msk [vmem:[#allocation2 + $0x28] sm:$0xff] %vm280_vm0, %v463_v39  ;;  %v486_v43 = vpack.c.bf16 %v479_v42, %v478_v41 }
 0x10b   : > { %577 = vrot.lane.b32.xlu0 %v486_v43, %s1060_s23  ;;  %974 = vmatprep.mubr.msk.bf16.mxu1 %vm491_vm2, %v486_v43 }
 0x10c   : > { %975 = vmatmul.mubr.msk.bf16.vlgmr.msra.gmra.mrb[0].mxu1 %vm491_vm2, %v487_v45 }
 0x10d   : > { %983 = vmatpush3.bf16.msra.mxu1 %v506_v15  ;;  %v484_v47 = vld [vmem:[#allocation2 + $0x30] sm:$0xff] }
 0x10e   : > { %v482_v46 = vld [vmem:[#allocation2 + $0x20] sm:$0xff] }
 0x10f   : > { %579 = vrot.lane.b32.xlu0 %v487_v45, %s1060_s23  ;;  %v485_v48 = vld [vmem:[#allocation2 + $0x38] sm:$0xff] }
 0x110   : > { %v483_v49 = vld [vmem:[#allocation2 + $0x28] sm:$0xff]  ;;  %v489_v51 = vpack.c.bf16 %v485_v48, %v484_v47 }
 0x111   : > { %v488_v50 = vpack.c.bf16 %v483_v49, %v482_v46 }
 0x113   : > { %581 = vrot.lane.b32.xlu1 %v488_v50, %s1060_s23  ;;  %978 = vmatprep.mubr.msk.bf16.mxu1 %vm491_vm2, %v488_v50 }
 0x114   : > { %979 = vmatmul.mubr.msk.bf16.gmra.mrb[4].mxu1 %vm491_vm2, %v489_v51  ;;  %733 = vperm.xlu0 %1022, %v907_v52  }
 0x117   : > { %583 = vrot.lane.b32.xlu1 %v489_v51, %s1060_s23 }
 0x17d   : > { %v578_v54 = vpop.permute.xlu0 %577 }
 0x17e   : > { %984 = vmatprep.mubr.msk.bf16.mxu1 %vm491_vm2, %v578_v54 }
 0x181   : > { %v580_v55 = vpop.permute.xlu0 %579 }
 0x182   : > { %985 = vmatmul.mubr.msk.bf16.vlgmr.msra.gmra.mrb[8].mxu1 %vm491_vm2, %v580_v55 }
 0x185   : > { %v582_v56 = vpop.permute.xlu1 %581 }
 0x186   : > { %988 = vmatprep.mubr.msk.bf16.mxu1 %vm491_vm2, %v582_v56 }
 0x189   : > { %v584_v57 = vpop.permute.xlu1 %583 }
 0x18a   : > { %989 = vmatmul.mubr.msk.bf16.gmra.mrb[12].mxu1 %vm491_vm2, %v584_v57 }
 0x193   : > { %v1177_v10 = vpop.permute.xlu0 %733 }
 0x1df   : > { %v976_v58 = vpop.f32.mrb[0].mxu1 }
 0x1e0   : > { %v542_v59 = vpop.f32.mrb[1].mxu1 }
 0x1e1   : > { %v977_v60 = vpop.f32.mrb[2].mxu1 }
 0x1e2   : > { %v545_v61 = vpop.f32.mrb[3].mxu1 }
 0x1e7   : > { %v1173_v62 = vpop.f32.mrb[4].mxu1 }
 0x1e8   : > { %v558_v63 = vpop.f32.mrb[5].mxu1 }
 0x1e9   : > { %v1175_v0 = vpop.f32.mrb[6].mxu1 }
 0x1ea   : > { %v561_v1 = vpop.f32.mrb[7].mxu1 }
 0x255   : > { %v986_v2 = vpop.f32.mrb[8].mxu1 }
 0x256   : > { %674 = vrot.lane.b32.xlu0 %v986_v2, %s1062_s24  ;;  %v631_v3 = vpop.f32.mrb[9].mxu1 }
 0x257   : > { %670 = vrot.lane.b32.xlu1 %v631_v3, %s1062_s24  ;;  %v987_v4 = vpop.f32.mrb[10].mxu1 }
 0x258   : > { %v634_v5 = vpop.f32.mrb[11].mxu1 }
 0x25b   : > { %676 = vrot.lane.b32.xlu1 %v987_v4, %s1062_s24 }
 0x25d   : > { %v990_v6 = vpop.f32.mrb[12].mxu1 }
 0x25e   : > { %v647_v7 = vpop.f32.mrb[13].mxu1 }
 0x25f   : > { %672 = vrot.lane.b32.xlu1 %v634_v5, %s1062_s24  ;;  %678 = vrot.lane.b32.xlu0 %v647_v7, %s1062_s24  ;;  %v991_v8 = vpop.f32.mrb[14].mxu1 }
 0x260   : > { %v650_v9 = vpop.f32.mrb[15].mxu1 }
 0x263   : > { %682 = vrot.lane.b32.xlu0 %v990_v6, %s1062_s24  ;;  %680 = vrot.lane.b32.xlu1 %v650_v9, %s1062_s24 }
 0x267   : > { %684 = vrot.lane.b32.xlu1 %v991_v8, %s1062_s24 }
 0x2c8   : > { %v675_v12 = vpop.permute.xlu0 %674 }
 0x2c9   : > { %v697_v13 = vsel %vm694_vm3, %v976_v58, %v675_v12  ;;  %v671_v14 = vpop.permute.xlu1 %670 }
 0x2ca   : > { %v712_v15 = vadd.f32 %v906_v11, %v697_v13  ;;  %v695_v16 = vsel %vm694_vm3, %v542_v59, %v671_v14 }
 0x2cb   : > { %v710_v17 = vadd.f32 %v906_v11, %v695_v16 }
 0x2cc   : > { %vm720_vm4 = vcmp.gt.f32.partialorder %v712_v15, 0.0  ;;  %v738_v18 = vmul.f32 %v1177_v10, %v712_v15 }
 0x2cd   : > { %vm718_vm5 = vcmp.gt.f32.partialorder %v710_v17, 0.0  ;;  %v736_v19 = vmul.f32 %v1177_v10, %v710_v17  ;;  %v677_v20 = vpop.permute.xlu1 %676 }
 0x2ce   : > { %v746_v21 = vsel %vm720_vm4, %v712_v15, %v738_v18  ;;  %v698_v22 = vsel %vm694_vm3, %v977_v60, %v677_v20 }
 0x2cf   : > { %v920_v23 = vpack.c.bf16 %v746_v21, %v746_v21  ;;  %v744_v24 = vsel %vm718_vm5, %v710_v17, %v736_v19  ;;  %v713_v25 = vadd.f32 %v906_v11, %v698_v22 }
 0x2d0   : > { %v918_v26 = vpack.c.bf16 %v744_v24, %v744_v24 }
 0x2d1   : > { %787 = vst.msk [vmem:[%s1191_s6 + $0x8] sm:$0xf] %vm784_vm6, %v920_v23  ;;  %vm721_vm7 = vcmp.gt.f32.partialorder %v713_v25, 0.0  ;;  %v739_v27 = vmul.f32 %v1177_v10, %v713_v25  ;;  %v673_v28 = vpop.permute.xlu1 %672  ;;  %v679_v29 = vpop.permute.xlu0 %678 }
 0x2d2   : > { %785 = vst.msk [vmem:[%s1191_s6] sm:$0xf] %vm784_vm6, %v918_v26  ;;  %v696_v30 = vsel %vm694_vm3, %v545_v61, %v673_v28  ;;  %v699_v31 = vsel %vm694_vm3, %v558_v63, %v679_v29 }
 0x2d3   : > { %v747_v32 = vsel %vm721_vm7, %v713_v25, %v739_v27  ;;  %v711_v33 = vadd.f32 %v906_v11, %v696_v30  ;;  %v714_v34 = vadd.f32 %v906_v11, %v699_v31 }
 0x2d4   : > { %v921_v35 = vpack.c.bf16 %v747_v32, %v747_v32 }
 0x2d5   : > { %vm719_vm8 = vcmp.gt.f32.partialorder %v711_v33, 0.0  ;;  %v737_v36 = vmul.f32 %v1177_v10, %v711_v33  ;;  %vm722_vm9 = vcmp.gt.f32.partialorder %v714_v34, 0.0  ;;  %v740_v37 = vmul.f32 %v1177_v10, %v714_v34  ;;  %v683_v38 = vpop.permute.xlu0 %682  ;;  %v681_v39 = vpop.permute.xlu1 %680 }
 0x2d6   : > { %788 = vst.msk [vmem:[%s1191_s6 + $0xc] sm:$0xf] %vm784_vm6, %v921_v35  ;;  %v701_v40 = vsel %vm694_vm3, %v1173_v62, %v683_v38  ;;  %v700_v41 = vsel %vm694_vm3, %v561_v1, %v681_v39 }
 0x2d7   : > { %v745_v42 = vsel %vm719_vm8, %v711_v33, %v737_v36  ;;  %v748_v43 = vsel %vm722_vm9, %v714_v34, %v740_v37  ;;  %v716_v44 = vadd.f32 %v906_v11, %v701_v40  ;;  %v715_v45 = vadd.f32 %v906_v11, %v700_v41 }
 0x2d8   : > { %v919_v46 = vpack.c.bf16 %v745_v42, %v745_v42  ;;  %v922_v47 = vpack.c.bf16 %v748_v43, %v748_v43 }
 0x2d9   : > { %vm724_vm10 = vcmp.gt.f32.partialorder %v716_v44, 0.0  ;;  %v742_v48 = vmul.f32 %v1177_v10, %v716_v44  ;;  %vm723_vm11 = vcmp.gt.f32.partialorder %v715_v45, 0.0  ;;  %v741_v49 = vmul.f32 %v1177_v10, %v715_v45  ;;  %v685_v50 = vpop.permute.xlu1 %684 }
 0x2da   : > { %786 = vst.msk [vmem:[%s1191_s6 + $0x4] sm:$0xf] %vm784_vm6, %v919_v46  ;;  %789 = vst.msk [vmem:[%s1191_s6 + $0x10] sm:$0xf] %vm784_vm6, %v922_v47  ;;  %v702_v51 = vsel %vm694_vm3, %v1175_v0, %v685_v50 }
 0x2db   : > { %v750_v52 = vsel %vm724_vm10, %v716_v44, %v742_v48  ;;  %v749_v53 = vsel %vm723_vm11, %v715_v45, %v741_v49  ;;  %v717_v54 = vadd.f32 %v906_v11, %v702_v51 }
 0x2dc   : > { %v924_v55 = vpack.c.bf16 %v750_v52, %v750_v52  ;;  %v923_v56 = vpack.c.bf16 %v749_v53, %v749_v53 }
 0x2dd   : > { %vm725_vm12 = vcmp.gt.f32.partialorder %v717_v54, 0.0  ;;  %v743_v57 = vmul.f32 %v1177_v10, %v717_v54 }
 0x2de   : > { %791 = vst.msk [vmem:[%s1191_s6 + $0x18] sm:$0xf] %vm784_vm6, %v924_v55  ;;  %790 = vst.msk [vmem:[%s1191_s6 + $0x14] sm:$0xf] %vm784_vm6, %v923_v56 }
 0x2df   : > { %v751_v58 = vsel %vm725_vm12, %v717_v54, %v743_v57 }
 0x2e0   : > { %v925_v59 = vpack.c.bf16 %v751_v58, %v751_v58 }
 0x2e2   : > { %792 = vst.msk [vmem:[%s1191_s6 + $0x1c] sm:$0xf] %vm784_vm6, %v925_v59 }
 0x2e3 PF: > { %s17_s22 = sadd.s32 1, %s1057_s22   ;;  %s1238_s20 = smov %s1053_s21 }
 0x2e4   : > { %p14_p5 = scmp.ge.s32.totalorder %s17_s22, 4   ;;  %s1239_s21 = smov %s1241_s4 }
 0x2e6   :  { %16 = sbr.rel (!%p14_p5) target bundleno = 3 (0x3), region = 81 }

// kernel: ssl_forward.5
= control target key start
LH: loop header
LB: loop body
LE: loop exit
PB: predicated region body
PF: predicated region fallthrough
CT: control target
= control target key end

     0   :  { %v644_v1 = vmov 0   ;;  %vm135_vm0 = vcmask 523264   ;;  %vm468_vm1 = vcmask 31744   ;;  %s848_s3 = inlined_call_operand.vmem [shape: bf16[64,4], index: 3, kind: input, shape index: {}]   ;;  %s849_s2 = inlined_call_operand.vmem [shape: bf16[64,4], index: 2, kind: input, shape index: {}]   ;;  %s850_s4 = inlined_call_operand.<no memory space> [shape: f32[1,1], index: 4, kind: input, shape index: {}]   ;;  %s851_s1 = inlined_call_operand.vmem [shape: bf16[128,64], index: 1, kind: input, shape index: {}]   ;;  %s852_s0 = inlined_call_operand.vmem [shape: bf16[128,64], index: 0, kind: input, shape index: {}]   ;;  %s853_s5 = inlined_call_operand.vmem [shape: f32[128,4], index: 5, kind: output, shape index: {}]  }
   0x1   :  { %v620_v0 = vld [vmem:[%s848_s3] sm:$0xff]   ;;  %619 = vset.pattern.permute.xlu0 %v644_v1  ;;  %v10_v2 = vstv %s850_s4  ;;  %v622_v4 = vld [vmem:[%s848_s3 + $0x8] sm:$0xff]   ;;  %v624_v6 = vld [vmem:[%s848_s3 + $0x10] sm:$0xff]  }
   0x2   :  { %v621_v3 = vld [vmem:[%s849_s2] sm:$0xff]   ;;  %11 = vst [vmem:[#allocation2] sm:$0x1] %v10_v2  ;;  %554 = vmatprep.subr.bf16.mxu1 %v620_v0  ;;  %v623_v5 = vld [vmem:[%s849_s2 + $0x8] sm:$0xff]   ;;  %v625_v7 = vld [vmem:[%s849_s2 + $0x10] sm:$0xff]  }
   0x3   :  { %578 = vmatprep.subr.bf16.mxu0 %v621_v3  ;;  %555 = vmatpush3.bf16.msra.mxu1 %v620_v0  ;;  %v626_v8 = vld [vmem:[%s848_s3 + $0x18] sm:$0xff]   ;;  %v628_v10 = vld [vmem:[%s851_s1] sm:$0xff]   ;;  %v630_v12 = vld [vmem:[%s851_s1 + $0x8] sm:$0xff]  }
   0x4   :  { %579 = vmatpush3.bf16.msra.mxu0 %v621_v3  ;;  %556 = vmatprep.subr.bf16.mxu1 %v622_v4  ;;  %v627_v9 = vld [vmem:[%s849_s2 + $0x18] sm:$0xff]   ;;  %v629_v11 = vld [vmem:[%s852_s0] sm:$0xff]   ;;  %v631_v13 = vld [vmem:[%s852_s0 + $0x8] sm:$0xff]  }
   0x5   :  { %580 = vmatprep.subr.bf16.mxu0 %v623_v5  ;;  %562 = vmatprep.mubr.msk.bf16.mxu1 %vm135_vm0, %v628_v10  ;;  %v632_v14 = vld [vmem:[%s851_s1 + $0x10] sm:$0xff]   ;;  %v634_v16 = vld [vmem:[%s851_s1 + $0x18] sm:$0xff]   ;;  %v636_v18 = vld [vmem:[%s851_s1 + $0x20] sm:$0xff]  }
   0x6   :  { %586 = vmatprep.mubr.msk.bf16.mxu0 %vm135_vm0, %v629_v11  ;;  %v633_v15 = vld [vmem:[%s852_s0 + $0x10] sm:$0xff]   ;;  %v635_v17 = vld [vmem:[%s852_s0 + $0x18] sm:$0xff]   ;;  %v637_v19 = vld [vmem:[%s852_s0 + $0x20] sm:$0xff]  }
   0x7   :  { %557 = vmatpush3.bf16.msra.mxu1 %v622_v4  ;;  %v638_v21 = vld [vmem:[%s851_s1 + $0x28] sm:$0xff]   ;;  %v640_v23 = vld [vmem:[%s851_s1 + $0x30] sm:$0xff]   ;;  %v642_v25 = vld [vmem:[%s851_s1 + $0x38] sm:$0xff]  }
   0x8   :  { %581 = vmatpush3.bf16.msra.mxu0 %v623_v5  ;;  %558 = vmatprep.subr.bf16.mxu1 %v624_v6  ;;  %v639_v22 = vld [vmem:[%s852_s0 + $0x28] sm:$0xff]   ;;  %v641_v24 = vld [vmem:[%s852_s0 + $0x30] sm:$0xff]   ;;  %v643_v26 = vld [vmem:[%s852_s0 + $0x38] sm:$0xff]  }
   0x9   :  { %582 = vmatprep.subr.bf16.mxu0 %v625_v7  ;;  %v529_v20 = vld [vmem:[#allocation2] ss:$0 sm:$0xff] }
   0xa   :  { %449 = vperm.xlu0 %619, %v529_v20  }
   0xb   :  { %559 = vmatpush3.bf16.msra.mxu1 %v624_v6 }
   0xc   :  { %583 = vmatpush3.bf16.msra.mxu0 %v625_v7  ;;  %560 = vmatprep.subr.bf16.mxu1 %v626_v8 }
   0xd   :  { %584 = vmatprep.subr.bf16.mxu0 %v627_v9 }
   0xf   :  { %561 = vmatpush3.bf16.msra.mxu1 %v626_v8 }
  0x10   :  { %585 = vmatpush3.bf16.msra.mxu0 %v627_v9 }
  0x12   :  { %563 = vmatmul.mubr.msk.bf16.vlgmr.msra.gmra.mrb[0].mxu1 %vm135_vm0, %v630_v12 }
  0x13   :  { %587 = vmatmul.mubr.msk.bf16.vlgmr.msra.gmra.mrb[0].mxu0 %vm135_vm0, %v631_v13  ;;  %566 = vmatprep.mubr.msk.bf16.mxu1 %vm135_vm0, %v632_v14 }
  0x14   :  { %590 = vmatprep.mubr.msk.bf16.mxu0 %vm135_vm0, %v633_v15 }
  0x1a   :  { %567 = vmatmul.mubr.msk.bf16.gmra.mrb[4].mxu1 %vm135_vm0, %v634_v16 }
  0x1b   :  { %591 = vmatmul.mubr.msk.bf16.gmra.mrb[4].mxu0 %vm135_vm0, %v635_v17  ;;  %570 = vmatprep.mubr.msk.bf16.mxu1 %vm135_vm0, %v636_v18 }
  0x1c   :  { %594 = vmatprep.mubr.msk.bf16.mxu0 %vm135_vm0, %v637_v19 }
  0x22   :  { %571 = vmatmul.mubr.msk.bf16.gmra.mrb[8].mxu1 %vm135_vm0, %v638_v21 }
  0x23   :  { %595 = vmatmul.mubr.msk.bf16.gmra.mrb[8].mxu0 %vm135_vm0, %v639_v22  ;;  %574 = vmatprep.mubr.msk.bf16.mxu1 %vm135_vm0, %v640_v23 }
  0x24   :  { %598 = vmatprep.mubr.msk.bf16.mxu0 %vm135_vm0, %v641_v24 }
  0x2a   :  { %575 = vmatmul.mubr.msk.bf16.gmra.mrb[12].mxu1 %vm135_vm0, %v642_v25 }
  0x2b   :  { %599 = vmatmul.mubr.msk.bf16.gmra.mrb[12].mxu0 %vm135_vm0, %v643_v26 }
  0x89   :  { %v766_v28 = vpop.permute.xlu0 %449 }
  0xe5   :  { %v564_v27 = vpop.f32.mrb[0].mxu1 }
  0xe6   :  { %v588_v29 = vpop.f32.mrb[0].mxu0  ;;  %v194_v30 = vpop.f32.mrb[1].mxu1 }
  0xe7   :  { %v388_v31 = vadd.f32 %v588_v29, %v564_v27  ;;  %v379_v32 = vpop.f32.mrb[1].mxu0  ;;  %v565_v33 = vpop.f32.mrb[2].mxu1 }
  0xe8   :  { %v380_v34 = vadd.f32 %v379_v32, %v194_v30  ;;  %v589_v35 = vpop.f32.mrb[2].mxu0  ;;  %v197_v36 = vpop.f32.mrb[3].mxu1 }
  0xe9   :  { %v454_v37 = vadd.f32 %v766_v28, %v388_v31  ;;  %v391_v38 = vadd.f32 %v589_v35, %v565_v33  ;;  %v382_v39 = vpop.f32.mrb[3].mxu0 }
  0xea   :  { %v452_v40 = vadd.f32 %v766_v28, %v380_v34  ;;  %v383_v41 = vadd.f32 %v382_v39, %v197_v36 }
  0xeb   :  { %471 = vst.msk [vmem:[%s853_s5 + $0x10] sm:$0xff] %vm468_vm1, %v454_v37  ;;  %v455_v42 = vadd.f32 %v766_v28, %v391_v38 }
  0xec   :  { %469 = vst.msk [vmem:[%s853_s5] sm:$0xff] %vm468_vm1, %v452_v40  ;;  %v453_v43 = vadd.f32 %v766_v28, %v383_v41 }
  0xed   :  { %472 = vst.msk [vmem:[%s853_s5 + $0x18] sm:$0xff] %vm468_vm1, %v455_v42  ;;  %v568_v44 = vpop.f32.mrb[4].mxu1 }
  0xee   :  { %470 = vst.msk [vmem:[%s853_s5 + $0x8] sm:$0xff] %vm468_vm1, %v453_v43  ;;  %v592_v45 = vpop.f32.mrb[4].mxu0  ;;  %v210_v46 = vpop.f32.mrb[5].mxu1 }
  0xef   :  { %v404_v47 = vadd.f32 %v592_v45, %v568_v44  ;;  %v395_v48 = vpop.f32.mrb[5].mxu0  ;;  %v569_v49 = vpop.f32.mrb[6].mxu1 }
  0xf0   :  { %v396_v50 = vadd.f32 %v395_v48, %v210_v46  ;;  %v593_v51 = vpop.f32.mrb[6].mxu0  ;;  %v213_v52 = vpop.f32.mrb[7].mxu1 }
  0xf1   :  { %v458_v53 = vadd.f32 %v766_v28, %v404_v47  ;;  %v407_v54 = vadd.f32 %v593_v51, %v569_v49  ;;  %v398_v55 = vpop.f32.mrb[7].mxu0 }
  0xf2   :  { %v456_v56 = vadd.f32 %v766_v28, %v396_v50  ;;  %v399_v57 = vadd.f32 %v398_v55, %v213_v52 }
  0xf3   :  { %475 = vst.msk [vmem:[%s853_s5 + $0x30] sm:$0xff] %vm468_vm1, %v458_v53  ;;  %v459_v58 = vadd.f32 %v766_v28, %v407_v54 }
  0xf4   :  { %473 = vst.msk [vmem:[%s853_s5 + $0x20] sm:$0xff] %vm468_vm1, %v456_v56  ;;  %v457_v59 = vadd.f32 %v766_v28, %v399_v57 }
  0xf5   :  { %476 = vst.msk [vmem:[%s853_s5 + $0x38] sm:$0xff] %vm468_vm1, %v459_v58  ;;  %v572_v60 = vpop.f32.mrb[8].mxu1 }
  0xf6   :  { %474 = vst.msk [vmem:[%s853_s5 + $0x28] sm:$0xff] %vm468_vm1, %v457_v59  ;;  %v596_v61 = vpop.f32.mrb[8].mxu0  ;;  %v226_v62 = vpop.f32.mrb[9].mxu1 }
  0xf7   :  { %v420_v63 = vadd.f32 %v596_v61, %v572_v60  ;;  %v411_v0 = vpop.f32.mrb[9].mxu0  ;;  %v573_v1 = vpop.f32.mrb[10].mxu1 }
  0xf8   :  { %v412_v2 = vadd.f32 %v411_v0, %v226_v62  ;;  %v597_v3 = vpop.f32.mrb[10].mxu0  ;;  %v229_v4 = vpop.f32.mrb[11].mxu1 }
  0xf9   :  { %v462_v5 = vadd.f32 %v766_v28, %v420_v63  ;;  %v423_v6 = vadd.f32 %v597_v3, %v573_v1  ;;  %v414_v7 = vpop.f32.mrb[11].mxu0 }
  0xfa   :  { %v460_v8 = vadd.f32 %v766_v28, %v412_v2  ;;  %v415_v9 = vadd.f32 %v414_v7, %v229_v4 }
  0xfb   :  { %479 = vst.msk [vmem:[%s853_s5 + $0x50] sm:$0xff] %vm468_vm1, %v462_v5  ;;  %v463_v10 = vadd.f32 %v766_v28, %v423_v6 }
  0xfc   :  { %477 = vst.msk [vmem:[%s853_s5 + $0x40] sm:$0xff] %vm468_vm1, %v460_v8  ;;  %v461_v11 = vadd.f32 %v766_v28, %v415_v9 }
  0xfd   :  { %480 = vst.msk [vmem:[%s853_s5 + $0x58] sm:$0xff] %vm468_vm1, %v463_v10  ;;  %v576_v12 = vpop.f32.mrb[12].mxu1 }
  0xfe   :  { %478 = vst.msk [vmem:[%s853_s5 + $0x48] sm:$0xff] %vm468_vm1, %v461_v11  ;;  %v600_v13 = vpop.f32.mrb[12].mxu0  ;;  %v242_v14 = vpop.f32.mrb[13].mxu1 }
  0xff   :  { %v436_v15 = vadd.f32 %v600_v13, %v576_v12  ;;  %v427_v16 = vpop.f32.mrb[13].mxu0  ;;  %v577_v17 = vpop.f32.mrb[14].mxu1 }
 0x100   :  { %v428_v18 = vadd.f32 %v427_v16, %v242_v14  ;;  %v601_v19 = vpop.f32.mrb[14].mxu0  ;;  %v245_v20 = vpop.f32.mrb[15].mxu1 }
 0x101   :  { %v466_v21 = vadd.f32 %v766_v28, %v436_v15  ;;  %v439_v22 = vadd.f32 %v601_v19, %v577_v17  ;;  %v430_v23 = vpop.f32.mrb[15].mxu0 }
 0x102   :  { %v464_v24 = vadd.f32 %v766_v28, %v428_v18  ;;  %v431_v25 = vadd.f32 %v430_v23, %v245_v20 }
 0x103   :  { %483 = vst.msk [vmem:[%s853_s5 + $0x70] sm:$0xff] %vm468_vm1, %v466_v21  ;;  %v467_v26 = vadd.f32 %v766_v28, %v439_v22 }
 0x104   :  { %481 = vst.msk [vmem:[%s853_s5 + $0x60] sm:$0xff] %vm468_vm1, %v464_v24  ;;  %v465_v27 = vadd.f32 %v766_v28, %v431_v25 }
 0x105   :  { %484 = vst.msk [vmem:[%s853_s5 + $0x78] sm:$0xff] %vm468_vm1, %v467_v26 }
 0x106   :  { %482 = vst.msk [vmem:[%s853_s5 + $0x68] sm:$0xff] %vm468_vm1, %v465_v27 }

</bundles_post_ra>
